<compile_context>
chip_gen: v7x
topology: tpu7x:2x2x1
jax: 0.10.0
libtpu: 0.0.40
codegen_flags: <defaults>
</compile_context>

<pallas_src>
import functools

import jax
import jax.numpy as jnp
from jax.experimental import pallas as pl
from jax.experimental.pallas import tpu as pltpu

NUM_CLASSES = 196
FEAT_CHANNELS = 1280  # efficientnet_b1 final feature channels


def _head_kernel(x_ref, w_ref, b_ref, o_ref, acc_ref, *, hw, inv_hw):
    # x_ref  : (TN, HW, C) feature tile, native dtype, channels lane-dense.
    # w_ref  : (C, K) bf16 classifier weight (pre-transposed), VMEM-resident.
    # b_ref  : (1, K)  f32 bias, VMEM-resident.
    # o_ref  : (TN, K) f32 logits.
    # acc_ref: (TN, C) f32 scratch accumulator for the spatial sum.
    #
    # AdaptiveAvgPool2d(1) + flatten == mean over the HW axis.  Accumulate
    # slice-by-slice in f32 so the kernel never materializes a (TN, HW, C)
    # f32 copy of the tile (hw is a small static trip count; static slices
    # are free ref views).
    acc_ref[...] = x_ref[:, 0, :].astype(jnp.float32)
    for s in range(1, hw):
        acc_ref[...] += x_ref[:, s, :].astype(jnp.float32)
    pooled = (acc_ref[...] * inv_hw).astype(jnp.bfloat16)           # (TN, C)
    # nn.Linear: y = pooled @ W^T + b ; w_ref already holds W^T (bf16);
    # MXU accumulates in f32.
    logits = jnp.dot(pooled, w_ref[...],
                     preferred_element_type=jnp.float32)            # (TN, K)
    o_ref[...] = logits + b_ref[...]                                # bias bcast


def _round_up(v, m):
    return -(-v // m) * m


def _pick_tile_n(n, hw, c, itemsize, act_budget_bytes=16 * 1024 * 1024):
    """Pick the batch tile TN.

    Largest TN (<=128) whose double-buffered activation pair fits the
    activation budget, additionally capped so the grid has >= 2 steps when
    n >= 16 (lets the "parallel" batch axis shard across both v7x TensorCores
    and overlaps output writeback with the next tile's DMA).
    """
    per_row = _round_up(hw, 8) * _round_up(c, 128) * itemsize   # VMEM layout
    max_rows = max(8, act_budget_bytes // (2 * per_row))
    tn = min(n, 128, int(max_rows))
    if n >= 16:
        tn = min(tn, _round_up(-(-n // 2), 8))   # ceil(n/2), sublane aligned
    if tn < n:
        tn = max(8, (tn // 8) * 8)               # sublane-aligned partial tile
    return tn


def car_identifier_head(feats_nhwc, weight_ck, bias_k):
    """Pool + classify head of CarIdentifier.

    feats_nhwc: (N, H, W, C) backbone feature map in NHWC layout (the natural
        TPU conv output layout - no transpose is performed).  Pass bf16 when
        possible: the kernel DMAs the native dtype and pools in f32, so bf16
        halves the dominant HBM read.
    weight_ck:  (C, K) = transpose of the PyTorch nn.Linear weight (K, C).
    bias_k:     (K,).
    Returns (N, K) float32 logits.
    """
    n, h, w, c = feats_nhwc.shape
    hw = h * w
    k = weight_ck.shape[1]

    # (N, H, W, C) -> (N, HW, C): merging adjacent leading dims is free.
    x = feats_nhwc.reshape(n, hw, c)
    w_bf16 = weight_ck.astype(jnp.bfloat16)      # halve the resident weight
    b2 = bias_k.reshape(1, k).astype(jnp.float32)

    tn = _pick_tile_n(n, hw, c, x.dtype.itemsize)
    grid = (pl.cdiv(n, tn),)

    # VMEM accounting (padded layouts): 2x activation tile (double-buffered),
    # weight + bias (constant index map -> fetched once; conservatively
    # counted twice), f32 accumulator scratch, 2x output tile.  The limit is
    # set with headroom and capped below v7x's 64 MiB physical VMEM.
    c_pad = _round_up(c, 128)
    k_pad = _round_up(k, 128)
    hw_pad = _round_up(hw, 8)
    vmem_bytes = (2 * tn * hw_pad * c_pad * x.dtype.itemsize
                  + 2 * (c * k_pad * 2 + 8 * k_pad * 4)
                  + tn * c_pad * 4
                  + 2 * tn * k_pad * 4)
    vmem_limit = int(min(48 * 2 ** 20,
                         max(16 * 2 ** 20, int(1.5 * vmem_bytes) + (4 << 20))))

    kernel = functools.partial(_head_kernel, hw=hw, inv_hw=1.0 / float(hw))

    flops = 2 * n * c * k + n * hw * c
    bytes_accessed = (x.size * x.dtype.itemsize
                      + w_bf16.size * 2 + b2.size * 4 + n * k * 4)

    return pl.pallas_call(
        kernel,
        out_shape=jax.ShapeDtypeStruct((n, k), jnp.float32),
        grid=grid,
        in_specs=[
            # Batch-tiled activations: prefetch tile i+1 while computing i.
            pl.BlockSpec((tn, hw, c), lambda i: (i, 0, 0)),
            # Weight + bias: constant block index -> loaded once, VMEM-resident.
            pl.BlockSpec((c, k), lambda i: (0, 0)),
            pl.BlockSpec((1, k), lambda i: (0, 0)),
        ],
        out_specs=pl.BlockSpec((tn, k), lambda i: (i, 0)),
        scratch_shapes=[pltpu.VMEM((tn, c), jnp.float32)],
        compiler_params=pltpu.CompilerParams(
            dimension_semantics=("parallel",),
            vmem_limit_bytes=vmem_limit),
        cost_estimate=pl.CostEstimate(
            flops=flops, transcendentals=0, bytes_accessed=bytes_accessed),
    )(x, w_bf16, b2)


def car_identifier_head_nchw(feats_nchw, weight_ck, bias_k):
    """Convenience shim for PyTorch-layout (N, C, H, W) callers.

    Note: the transpose below is a full extra HBM read+write of the feature
    map; prefer handing the kernel NHWC features directly.
    """
    return car_identifier_head(jnp.transpose(feats_nchw, (0, 2, 3, 1)),
                               weight_ck, bias_k)


def _reference_bf16(feats_nhwc, weight_ck, bias_k):
    """Reference matching the kernel's numerics (bf16 operands, f32 accum)."""
    pooled = jnp.mean(feats_nhwc.astype(jnp.float32), axis=(1, 2))   # (N, C)
    out = jnp.dot(pooled.astype(jnp.bfloat16),
                  weight_ck.astype(jnp.bfloat16),
                  preferred_element_type=jnp.float32)
    return out + bias_k[None, :].astype(jnp.float32)


def _reference_f32(feats_nhwc, weight_ck, bias_k):
    pooled = jnp.mean(feats_nhwc.astype(jnp.float32), axis=(1, 2))
    return pooled @ weight_ck.astype(jnp.float32) + bias_k[None, :]


if __name__ == "__main__":
    key = jax.random.PRNGKey(0)
    kx, kw, kb, kx2 = jax.random.split(key, 4)

    # Deterministic classifier params (nn.Linear(1280, 196)), pre-transposed
    # to (C_in, num_classes).
    w_ck = 0.01 * jax.random.normal(kw, (FEAT_CHANNELS, NUM_CLASSES),
                                    dtype=jnp.float32)
    b_k = 0.01 * jax.random.normal(kb, (NUM_CLASSES,), dtype=jnp.float32)

    # Test 1: small batch, f32 NHWC feature map (what enb1.features would emit
    # for a small image), single grid step.
    N, H, W, C = 2, 4, 4, FEAT_CHANNELS
    x = jax.random.normal(kx, (N, H, W, C), dtype=jnp.float32)
    out = jax.block_until_ready(car_identifier_head(x, w_ck, b_k))
    assert out.shape == (N, NUM_CLASSES)
    ref_bf16 = _reference_bf16(x, w_ck, b_k)
    assert jnp.allclose(out, ref_bf16, atol=5e-4, rtol=1e-3), \
        "mismatch vs bf16-matched reference (f32 features)"
    ref_f32 = _reference_f32(x, w_ck, b_k)
    assert jnp.allclose(out, ref_f32, atol=5e-3, rtol=5e-2), \
        "mismatch vs f32 reference"

    # Test 2: bf16 features, ragged batch (n % tn != 0), multi-step grid
    # (exercises the megacore split and partial-block masking paths).
    N2, H2, W2 = 18, 2, 2
    x2 = jax.random.normal(kx2, (N2, H2, W2, C),
                           dtype=jnp.float32).astype(jnp.bfloat16)
    out2 = jax.block_until_ready(car_identifier_head(x2, w_ck, b_k))
    assert out2.shape == (N2, NUM_CLASSES)
    ref2 = _reference_bf16(x2, w_ck, b_k)
    assert jnp.allclose(out2, ref2, atol=2e-3, rtol=2e-2), \
        "mismatch vs bf16-matched reference (bf16 features, ragged batch)"

    print("KERNEL_OK")
</pallas_src>

<mosaic_0001>
module attributes {stable_mosaic.version = 11 : i64} {
  func.func @_head_kernel(%arg0: i32, %arg1: memref<2x16x1280xf32, #tpu.memory_space<vmem>>, %arg2: memref<1280x196xbf16, #tpu.memory_space<vmem>>, %arg3: memref<1x196xf32, #tpu.memory_space<vmem>>, %arg4: memref<2x196xf32, #tpu.memory_space<vmem>>, %arg5: memref<2x1280xf32, #tpu.memory_space<vmem>>) attributes {dimension_semantics = [#tpu.dimension_semantics<parallel>], iteration_bounds = array<i64: 1>, scalar_prefetch = 0 : i64, scratch_operands = 1 : i64, tpu.core_type = #tpu.core_type<tc>, window_params = [{transform_indices = @transform_0, window_bounds = array<i64: 2, 16, 1280>}, {pipeline_mode = #tpu.pipeline_mode<synchronous>, transform_indices = @transform_1, window_bounds = array<i64: 1280, 196>}, {pipeline_mode = #tpu.pipeline_mode<synchronous>, transform_indices = @transform_2, window_bounds = array<i64: 1, 196>}, {transform_indices = @transform_3, window_bounds = array<i64: 2, 196>}]} {
    %c0 = arith.constant 0 : index
    %c0_0 = arith.constant 0 : index
    %c0_1 = arith.constant 0 : index
    %0 = vector.load %arg1[%c0, %c0_0, %c0_1] : memref<2x16x1280xf32, #tpu.memory_space<vmem>>, vector<2x1x1280xf32>
    %1 = vector.shape_cast %0 : vector<2x1x1280xf32> to vector<2x1280xf32>
    %c0_2 = arith.constant 0 : index
    %c0_3 = arith.constant 0 : index
    %2 = vector.load %arg5[%c0_2, %c0_3] : memref<2x1280xf32, #tpu.memory_space<vmem>>, vector<2x1280xf32>
    tpu.vector_store %arg5[%c0_2, %c0_3], %1 {strides = array<i32>} : memref<2x1280xf32, #tpu.memory_space<vmem>>, vector<2x1280xf32>,
    %c0_4 = arith.constant 0 : index
    %c0_5 = arith.constant 0 : index
    %3 = vector.load %arg5[%c0_4, %c0_5] : memref<2x1280xf32, #tpu.memory_space<vmem>>, vector<2x1280xf32>
    %c0_6 = arith.constant 0 : index
    %c1 = arith.constant 1 : index
    %c0_7 = arith.constant 0 : index
    %4 = vector.load %arg1[%c0_6, %c1, %c0_7] : memref<2x16x1280xf32, #tpu.memory_space<vmem>>, vector<2x1x1280xf32>
    %5 = vector.shape_cast %4 : vector<2x1x1280xf32> to vector<2x1280xf32>
    %6 = arith.addf %3, %5 : vector<2x1280xf32>
    %c0_8 = arith.constant 0 : index
    %c0_9 = arith.constant 0 : index
    %7 = vector.load %arg5[%c0_8, %c0_9] : memref<2x1280xf32, #tpu.memory_space<vmem>>, vector<2x1280xf32>
    tpu.vector_store %arg5[%c0_8, %c0_9], %6 {strides = array<i32>} : memref<2x1280xf32, #tpu.memory_space<vmem>>, vector<2x1280xf32>,
    %c0_10 = arith.constant 0 : index
    %c0_11 = arith.constant 0 : index
    %8 = vector.load %arg5[%c0_10, %c0_11] : memref<2x1280xf32, #tpu.memory_space<vmem>>, vector<2x1280xf32>
    %c0_12 = arith.constant 0 : index
    %c2 = arith.constant 2 : index
    %c0_13 = arith.constant 0 : index
    %9 = vector.load %arg1[%c0_12, %c2, %c0_13] : memref<2x16x1280xf32, #tpu.memory_space<vmem>>, vector<2x1x1280xf32>
    %10 = vector.shape_cast %9 : vector<2x1x1280xf32> to vector<2x1280xf32>
    %11 = arith.addf %8, %10 : vector<2x1280xf32>
    %c0_14 = arith.constant 0 : index
    %c0_15 = arith.constant 0 : index
    %12 = vector.load %arg5[%c0_14, %c0_15] : memref<2x1280xf32, #tpu.memory_space<vmem>>, vector<2x1280xf32>
    tpu.vector_store %arg5[%c0_14, %c0_15], %11 {strides = array<i32>} : memref<2x1280xf32, #tpu.memory_space<vmem>>, vector<2x1280xf32>,
    %c0_16 = arith.constant 0 : index
    %c0_17 = arith.constant 0 : index
    %13 = vector.load %arg5[%c0_16, %c0_17] : memref<2x1280xf32, #tpu.memory_space<vmem>>, vector<2x1280xf32>
    %c0_18 = arith.constant 0 : index
    %c3 = arith.constant 3 : index
    %c0_19 = arith.constant 0 : index
    %14 = vector.load %arg1[%c0_18, %c3, %c0_19] : memref<2x16x1280xf32, #tpu.memory_space<vmem>>, vector<2x1x1280xf32>
    %15 = vector.shape_cast %14 : vector<2x1x1280xf32> to vector<2x1280xf32>
    %16 = arith.addf %13, %15 : vector<2x1280xf32>
    %c0_20 = arith.constant 0 : index
    %c0_21 = arith.constant 0 : index
    %17 = vector.load %arg5[%c0_20, %c0_21] : memref<2x1280xf32, #tpu.memory_space<vmem>>, vector<2x1280xf32>
    tpu.vector_store %arg5[%c0_20, %c0_21], %16 {strides = array<i32>} : memref<2x1280xf32, #tpu.memory_space<vmem>>, vector<2x1280xf32>,
    %c0_22 = arith.constant 0 : index
    %c0_23 = arith.constant 0 : index
    %18 = vector.load %arg5[%c0_22, %c0_23] : memref<2x1280xf32, #tpu.memory_space<vmem>>, vector<2x1280xf32>
    %c0_24 = arith.constant 0 : index
    %c4 = arith.constant 4 : index
    %c0_25 = arith.constant 0 : index
    %19 = vector.load %arg1[%c0_24, %c4, %c0_25] : memref<2x16x1280xf32, #tpu.memory_space<vmem>>, vector<2x1x1280xf32>
    %20 = vector.shape_cast %19 : vector<2x1x1280xf32> to vector<2x1280xf32>
    %21 = arith.addf %18, %20 : vector<2x1280xf32>
    %c0_26 = arith.constant 0 : index
    %c0_27 = arith.constant 0 : index
    %22 = vector.load %arg5[%c0_26, %c0_27] : memref<2x1280xf32, #tpu.memory_space<vmem>>, vector<2x1280xf32>
    tpu.vector_store %arg5[%c0_26, %c0_27], %21 {strides = array<i32>} : memref<2x1280xf32, #tpu.memory_space<vmem>>, vector<2x1280xf32>,
    %c0_28 = arith.constant 0 : index
    %c0_29 = arith.constant 0 : index
    %23 = vector.load %arg5[%c0_28, %c0_29] : memref<2x1280xf32, #tpu.memory_space<vmem>>, vector<2x1280xf32>
    %c0_30 = arith.constant 0 : index
    %c5 = arith.constant 5 : index
    %c0_31 = arith.constant 0 : index
    %24 = vector.load %arg1[%c0_30, %c5, %c0_31] : memref<2x16x1280xf32, #tpu.memory_space<vmem>>, vector<2x1x1280xf32>
    %25 = vector.shape_cast %24 : vector<2x1x1280xf32> to vector<2x1280xf32>
    %26 = arith.addf %23, %25 : vector<2x1280xf32>
    %c0_32 = arith.constant 0 : index
    %c0_33 = arith.constant 0 : index
    %27 = vector.load %arg5[%c0_32, %c0_33] : memref<2x1280xf32, #tpu.memory_space<vmem>>, vector<2x1280xf32>
    tpu.vector_store %arg5[%c0_32, %c0_33], %26 {strides = array<i32>} : memref<2x1280xf32, #tpu.memory_space<vmem>>, vector<2x1280xf32>,
    %c0_34 = arith.constant 0 : index
    %c0_35 = arith.constant 0 : index
    %28 = vector.load %arg5[%c0_34, %c0_35] : memref<2x1280xf32, #tpu.memory_space<vmem>>, vector<2x1280xf32>
    %c0_36 = arith.constant 0 : index
    %c6 = arith.constant 6 : index
    %c0_37 = arith.constant 0 : index
    %29 = vector.load %arg1[%c0_36, %c6, %c0_37] : memref<2x16x1280xf32, #tpu.memory_space<vmem>>, vector<2x1x1280xf32>
    %30 = vector.shape_cast %29 : vector<2x1x1280xf32> to vector<2x1280xf32>
    %31 = arith.addf %28, %30 : vector<2x1280xf32>
    %c0_38 = arith.constant 0 : index
    %c0_39 = arith.constant 0 : index
    %32 = vector.load %arg5[%c0_38, %c0_39] : memref<2x1280xf32, #tpu.memory_space<vmem>>, vector<2x1280xf32>
    tpu.vector_store %arg5[%c0_38, %c0_39], %31 {strides = array<i32>} : memref<2x1280xf32, #tpu.memory_space<vmem>>, vector<2x1280xf32>,
    %c0_40 = arith.constant 0 : index
    %c0_41 = arith.constant 0 : index
    %33 = vector.load %arg5[%c0_40, %c0_41] : memref<2x1280xf32, #tpu.memory_space<vmem>>, vector<2x1280xf32>
    %c0_42 = arith.constant 0 : index
    %c7 = arith.constant 7 : index
    %c0_43 = arith.constant 0 : index
    %34 = vector.load %arg1[%c0_42, %c7, %c0_43] : memref<2x16x1280xf32, #tpu.memory_space<vmem>>, vector<2x1x1280xf32>
    %35 = vector.shape_cast %34 : vector<2x1x1280xf32> to vector<2x1280xf32>
    %36 = arith.addf %33, %35 : vector<2x1280xf32>
    %c0_44 = arith.constant 0 : index
    %c0_45 = arith.constant 0 : index
    %37 = vector.load %arg5[%c0_44, %c0_45] : memref<2x1280xf32, #tpu.memory_space<vmem>>, vector<2x1280xf32>
    tpu.vector_store %arg5[%c0_44, %c0_45], %36 {strides = array<i32>} : memref<2x1280xf32, #tpu.memory_space<vmem>>, vector<2x1280xf32>,
    %c0_46 = arith.constant 0 : index
    %c0_47 = arith.constant 0 : index
    %38 = vector.load %arg5[%c0_46, %c0_47] : memref<2x1280xf32, #tpu.memory_space<vmem>>, vector<2x1280xf32>
    %c0_48 = arith.constant 0 : index
    %c8 = arith.constant 8 : index
    %c0_49 = arith.constant 0 : index
    %39 = vector.load %arg1[%c0_48, %c8, %c0_49] : memref<2x16x1280xf32, #tpu.memory_space<vmem>>, vector<2x1x1280xf32>
    %40 = vector.shape_cast %39 : vector<2x1x1280xf32> to vector<2x1280xf32>
    %41 = arith.addf %38, %40 : vector<2x1280xf32>
    %c0_50 = arith.constant 0 : index
    %c0_51 = arith.constant 0 : index
    %42 = vector.load %arg5[%c0_50, %c0_51] : memref<2x1280xf32, #tpu.memory_space<vmem>>, vector<2x1280xf32>
    tpu.vector_store %arg5[%c0_50, %c0_51], %41 {strides = array<i32>} : memref<2x1280xf32, #tpu.memory_space<vmem>>, vector<2x1280xf32>,
    %c0_52 = arith.constant 0 : index
    %c0_53 = arith.constant 0 : index
    %43 = vector.load %arg5[%c0_52, %c0_53] : memref<2x1280xf32, #tpu.memory_space<vmem>>, vector<2x1280xf32>
    %c0_54 = arith.constant 0 : index
    %c9 = arith.constant 9 : index
    %c0_55 = arith.constant 0 : index
    %44 = vector.load %arg1[%c0_54, %c9, %c0_55] : memref<2x16x1280xf32, #tpu.memory_space<vmem>>, vector<2x1x1280xf32>
    %45 = vector.shape_cast %44 : vector<2x1x1280xf32> to vector<2x1280xf32>
    %46 = arith.addf %43, %45 : vector<2x1280xf32>
    %c0_56 = arith.constant 0 : index
    %c0_57 = arith.constant 0 : index
    %47 = vector.load %arg5[%c0_56, %c0_57] : memref<2x1280xf32, #tpu.memory_space<vmem>>, vector<2x1280xf32>
    tpu.vector_store %arg5[%c0_56, %c0_57], %46 {strides = array<i32>} : memref<2x1280xf32, #tpu.memory_space<vmem>>, vector<2x1280xf32>,
    %c0_58 = arith.constant 0 : index
    %c0_59 = arith.constant 0 : index
    %48 = vector.load %arg5[%c0_58, %c0_59] : memref<2x1280xf32, #tpu.memory_space<vmem>>, vector<2x1280xf32>
    %c0_60 = arith.constant 0 : index
    %c10 = arith.constant 10 : index
    %c0_61 = arith.constant 0 : index
    %49 = vector.load %arg1[%c0_60, %c10, %c0_61] : memref<2x16x1280xf32, #tpu.memory_space<vmem>>, vector<2x1x1280xf32>
    %50 = vector.shape_cast %49 : vector<2x1x1280xf32> to vector<2x1280xf32>
    %51 = arith.addf %48, %50 : vector<2x1280xf32>
    %c0_62 = arith.constant 0 : index
    %c0_63 = arith.constant 0 : index
    %52 = vector.load %arg5[%c0_62, %c0_63] : memref<2x1280xf32, #tpu.memory_space<vmem>>, vector<2x1280xf32>
    tpu.vector_store %arg5[%c0_62, %c0_63], %51 {strides = array<i32>} : memref<2x1280xf32, #tpu.memory_space<vmem>>, vector<2x1280xf32>,
    %c0_64 = arith.constant 0 : index
    %c0_65 = arith.constant 0 : index
    %53 = vector.load %arg5[%c0_64, %c0_65] : memref<2x1280xf32, #tpu.memory_space<vmem>>, vector<2x1280xf32>
    %c0_66 = arith.constant 0 : index
    %c11 = arith.constant 11 : index
    %c0_67 = arith.constant 0 : index
    %54 = vector.load %arg1[%c0_66, %c11, %c0_67] : memref<2x16x1280xf32, #tpu.memory_space<vmem>>, vector<2x1x1280xf32>
    %55 = vector.shape_cast %54 : vector<2x1x1280xf32> to vector<2x1280xf32>
    %56 = arith.addf %53, %55 : vector<2x1280xf32>
    %c0_68 = arith.constant 0 : index
    %c0_69 = arith.constant 0 : index
    %57 = vector.load %arg5[%c0_68, %c0_69] : memref<2x1280xf32, #tpu.memory_space<vmem>>, vector<2x1280xf32>
    tpu.vector_store %arg5[%c0_68, %c0_69], %56 {strides = array<i32>} : memref<2x1280xf32, #tpu.memory_space<vmem>>, vector<2x1280xf32>,
    %c0_70 = arith.constant 0 : index
    %c0_71 = arith.constant 0 : index
    %58 = vector.load %arg5[%c0_70, %c0_71] : memref<2x1280xf32, #tpu.memory_space<vmem>>, vector<2x1280xf32>
    %c0_72 = arith.constant 0 : index
    %c12 = arith.constant 12 : index
    %c0_73 = arith.constant 0 : index
    %59 = vector.load %arg1[%c0_72, %c12, %c0_73] : memref<2x16x1280xf32, #tpu.memory_space<vmem>>, vector<2x1x1280xf32>
    %60 = vector.shape_cast %59 : vector<2x1x1280xf32> to vector<2x1280xf32>
    %61 = arith.addf %58, %60 : vector<2x1280xf32>
    %c0_74 = arith.constant 0 : index
    %c0_75 = arith.constant 0 : index
    %62 = vector.load %arg5[%c0_74, %c0_75] : memref<2x1280xf32, #tpu.memory_space<vmem>>, vector<2x1280xf32>
    tpu.vector_store %arg5[%c0_74, %c0_75], %61 {strides = array<i32>} : memref<2x1280xf32, #tpu.memory_space<vmem>>, vector<2x1280xf32>,
    %c0_76 = arith.constant 0 : index
    %c0_77 = arith.constant 0 : index
    %63 = vector.load %arg5[%c0_76, %c0_77] : memref<2x1280xf32, #tpu.memory_space<vmem>>, vector<2x1280xf32>
    %c0_78 = arith.constant 0 : index
    %c13 = arith.constant 13 : index
    %c0_79 = arith.constant 0 : index
    %64 = vector.load %arg1[%c0_78, %c13, %c0_79] : memref<2x16x1280xf32, #tpu.memory_space<vmem>>, vector<2x1x1280xf32>
    %65 = vector.shape_cast %64 : vector<2x1x1280xf32> to vector<2x1280xf32>
    %66 = arith.addf %63, %65 : vector<2x1280xf32>
    %c0_80 = arith.constant 0 : index
    %c0_81 = arith.constant 0 : index
    %67 = vector.load %arg5[%c0_80, %c0_81] : memref<2x1280xf32, #tpu.memory_space<vmem>>, vector<2x1280xf32>
    tpu.vector_store %arg5[%c0_80, %c0_81], %66 {strides = array<i32>} : memref<2x1280xf32, #tpu.memory_space<vmem>>, vector<2x1280xf32>,
    %c0_82 = arith.constant 0 : index
    %c0_83 = arith.constant 0 : index
    %68 = vector.load %arg5[%c0_82, %c0_83] : memref<2x1280xf32, #tpu.memory_space<vmem>>, vector<2x1280xf32>
    %c0_84 = arith.constant 0 : index
    %c14 = arith.constant 14 : index
    %c0_85 = arith.constant 0 : index
    %69 = vector.load %arg1[%c0_84, %c14, %c0_85] : memref<2x16x1280xf32, #tpu.memory_space<vmem>>, vector<2x1x1280xf32>
    %70 = vector.shape_cast %69 : vector<2x1x1280xf32> to vector<2x1280xf32>
    %71 = arith.addf %68, %70 : vector<2x1280xf32>
    %c0_86 = arith.constant 0 : index
    %c0_87 = arith.constant 0 : index
    %72 = vector.load %arg5[%c0_86, %c0_87] : memref<2x1280xf32, #tpu.memory_space<vmem>>, vector<2x1280xf32>
    tpu.vector_store %arg5[%c0_86, %c0_87], %71 {strides = array<i32>} : memref<2x1280xf32, #tpu.memory_space<vmem>>, vector<2x1280xf32>,
    %c0_88 = arith.constant 0 : index
    %c0_89 = arith.constant 0 : index
    %73 = vector.load %arg5[%c0_88, %c0_89] : memref<2x1280xf32, #tpu.memory_space<vmem>>, vector<2x1280xf32>
    %c0_90 = arith.constant 0 : index
    %c15 = arith.constant 15 : index
    %c0_91 = arith.constant 0 : index
    %74 = vector.load %arg1[%c0_90, %c15, %c0_91] : memref<2x16x1280xf32, #tpu.memory_space<vmem>>, vector<2x1x1280xf32>
    %75 = vector.shape_cast %74 : vector<2x1x1280xf32> to vector<2x1280xf32>
    %76 = arith.addf %73, %75 : vector<2x1280xf32>
    %c0_92 = arith.constant 0 : index
    %c0_93 = arith.constant 0 : index
    %77 = vector.load %arg5[%c0_92, %c0_93] : memref<2x1280xf32, #tpu.memory_space<vmem>>, vector<2x1280xf32>
    tpu.vector_store %arg5[%c0_92, %c0_93], %76 {strides = array<i32>} : memref<2x1280xf32, #tpu.memory_space<vmem>>, vector<2x1280xf32>,
    %c0_94 = arith.constant 0 : index
    %c0_95 = arith.constant 0 : index
    %78 = vector.load %arg5[%c0_94, %c0_95] : memref<2x1280xf32, #tpu.memory_space<vmem>>, vector<2x1280xf32>
    %cst = arith.constant 6.250000e-02 : f32
    %79 = vector.broadcast %cst : f32 to vector<2x1280xf32>
    %80 = arith.mulf %78, %79 : vector<2x1280xf32>
    %81 = arith.truncf %80 : vector<2x1280xf32> to vector<2x1280xbf16>
    %c0_96 = arith.constant 0 : index
    %c0_97 = arith.constant 0 : index
    %82 = vector.load %arg2[%c0_96, %c0_97] : memref<1280x196xbf16, #tpu.memory_space<vmem>>, vector<1280x196xbf16>
    %cst_98 = arith.constant dense<0.000000e+00> : vector<2x196xf32>
    %83 = tpu.matmul %81, %82, %cst_98 {dimension_numbers = #tpu.dot_dimension_numbers<[1], [0], [0], [1], [0, 0, 1, 1], [], []>} : vector<2x1280xbf16>, vector<1280x196xbf16>, vector<2x196xf32> -> vector<2x196xf32>
    %c0_99 = arith.constant 0 : index
    %c0_100 = arith.constant 0 : index
    %84 = vector.load %arg3[%c0_99, %c0_100] : memref<1x196xf32, #tpu.memory_space<vmem>>, vector<1x196xf32>
    %85 = vector.broadcast %84 : vector<1x196xf32> to vector<2x196xf32>
    %86 = arith.addf %83, %85 : vector<2x196xf32>
    %c0_101 = arith.constant 0 : index
    %c0_102 = arith.constant 0 : index
    %87 = vector.load %arg4[%c0_101, %c0_102] : memref<2x196xf32, #tpu.memory_space<vmem>>, vector<2x196xf32>
    tpu.vector_store %arg4[%c0_101, %c0_102], %86 {strides = array<i32>} : memref<2x196xf32, #tpu.memory_space<vmem>>, vector<2x196xf32>,
    return
  }
  func.func @transform_0(%arg0: i32) -> (i32, i32, i32) {
    %c0_i32 = arith.constant 0 : i32
    %c0_i32_0 = arith.constant 0 : i32
    %c0_i32_1 = arith.constant 0 : i32
    return %arg0, %c0_i32, %c0_i32_0 : i32, i32, i32
  }
  func.func @transform_1(%arg0: i32) -> (i32, i32) {
    %c0_i32 = arith.constant 0 : i32
    %c0_i32_0 = arith.constant 0 : i32
    %c0_i32_1 = arith.constant 0 : i32
    return %c0_i32, %c0_i32_0 : i32, i32
  }
  func.func @transform_2(%arg0: i32) -> (i32, i32) {
    %c0_i32 = arith.constant 0 : i32
    %c0_i32_0 = arith.constant 0 : i32
    %c0_i32_1 = arith.constant 0 : i32
    return %c0_i32, %c0_i32_0 : i32, i32
  }
  func.func @transform_3(%arg0: i32) -> (i32, i32) {
    %c0_i32 = arith.constant 0 : i32
    %c0_i32_0 = arith.constant 0 : i32
    return %arg0, %c0_i32 : i32, i32
  }
}

</mosaic_0001>

<bundles_post_ra>
// kernel: tpu_custom_call.1
= control target key start
LH: loop header
LB: loop body
LE: loop exit
PB: predicated region body
PF: predicated region fallthrough
CT: control target
= control target key end

     0   :  { %v84_v42 = vlaneseq  ;;  %v2657_v47 = vmov 1935823168   ;;  %s3656_s0 = inlined_call_operand.vmem [shape: f32[2,16,1280], index: 0, kind: input, shape index: {}]   ;;  %s3657_s1 = inlined_call_operand.vmem [shape: bf16[1280,196], index: 1, kind: input, shape index: {}]   ;;  %s3658_s2 = inlined_call_operand.vmem [shape: f32[1,196], index: 2, kind: input, shape index: {}]   ;;  %s3659_s3 = inlined_call_operand.hbm [shape: f32[2,196], index: 3, kind: output, shape index: {}]  }
   0x1   :  { %v2393_v0 = vld [vmem:[%s3657_s1 + $0x4] ss:$8 sps:$4 sm:$0xff]   ;;  %v2397_v2 = vld [vmem:[%s3657_s1] ss:$8 sps:$4 sm:$0xff]   ;;  %v2399_v4 = vld [vmem:[%s3657_s1 + $0x14] ss:$8 sps:$4 sm:$0xff]   ;;  %v82_v48 = vunpack.c.l.s4 %v2657_v47 }
   0x2   :  { %v2395_v1 = vld [vmem:[%s3657_s1 + $0x204] ss:$8 sps:$4 sm:$0xff]   ;;  %1883 = vmatprep.subr.bf16.mxu1 %v2393_v0  ;;  %v2398_v3 = vld [vmem:[%s3657_s1 + $0x200] ss:$8 sps:$4 sm:$0xff]   ;;  %v2401_v5 = vld [vmem:[%s3657_s1 + $0x214] ss:$8 sps:$4 sm:$0xff]  }
   0x3   :  { %1965 = vmatprep.subr.bf16.mxu0 %v2395_v1  ;;  %1884 = vmatpush1.bf16.msra.mxu1 %v2397_v2  ;;  %v2403_v6 = vld [vmem:[%s3657_s1 + $0x10] ss:$8 sps:$4 sm:$0xff]   ;;  %v2405_v8 = vld [vmem:[%s3657_s1 + $0x24] ss:$8 sps:$4 sm:$0xff]   ;;  %v2409_v10 = vld [vmem:[%s3657_s1 + $0x20] ss:$8 sps:$4 sm:$0xff]   ;;  %v83_v62 = vunpack.c.0.s8 %v82_v48 }
   0x4   :  { %1966 = vmatpush1.bf16.msra.mxu0 %v2398_v3  ;;  %1885 = vmatprep.subr.bf16.mxu1 %v2399_v4  ;;  %v2404_v7 = vld [vmem:[%s3657_s1 + $0x210] ss:$8 sps:$4 sm:$0xff]   ;;  %v2407_v9 = vld [vmem:[%s3657_s1 + $0x224] ss:$8 sps:$4 sm:$0xff]   ;;  %v2410_v11 = vld [vmem:[%s3657_s1 + $0x220] ss:$8 sps:$4 sm:$0xff]  }
   0x5   :  { %1967 = vmatprep.subr.bf16.mxu0 %v2401_v5  ;;  %v2411_v12 = vld [vmem:[%s3657_s1 + $0x34] ss:$8 sps:$4 sm:$0xff]   ;;  %v2415_v14 = vld [vmem:[%s3657_s1 + $0x30] ss:$8 sps:$4 sm:$0xff]   ;;  %v2417_v16 = vld [vmem:[%s3657_s1 + $0x44] ss:$8 sps:$4 sm:$0xff]  }
   0x6   :  { %v2413_v13 = vld [vmem:[%s3657_s1 + $0x234] ss:$8 sps:$4 sm:$0xff]   ;;  %v2416_v15 = vld [vmem:[%s3657_s1 + $0x230] ss:$8 sps:$4 sm:$0xff]   ;;  %v2419_v17 = vld [vmem:[%s3657_s1 + $0x244] ss:$8 sps:$4 sm:$0xff]  }
   0x7   :  { %1886 = vmatpush1.bf16.msra.mxu1 %v2403_v6  ;;  %v2421_v18 = vld [vmem:[%s3657_s1 + $0x40] ss:$8 sps:$4 sm:$0xff]   ;;  %v2423_v20 = vld [vmem:[%s3657_s1 + $0x54] ss:$8 sps:$4 sm:$0xff]   ;;  %v2427_v22 = vld [vmem:[%s3657_s1 + $0x50] ss:$8 sps:$4 sm:$0xff]  }
   0x8   :  { %1968 = vmatpush1.bf16.msra.mxu0 %v2404_v7  ;;  %1887 = vmatprep.subr.bf16.mxu1 %v2405_v8  ;;  %v2422_v19 = vld [vmem:[%s3657_s1 + $0x240] ss:$8 sps:$4 sm:$0xff]   ;;  %v2425_v21 = vld [vmem:[%s3657_s1 + $0x254] ss:$8 sps:$4 sm:$0xff]   ;;  %v2428_v23 = vld [vmem:[%s3657_s1 + $0x250] ss:$8 sps:$4 sm:$0xff]  }
   0x9   :  { %1969 = vmatprep.subr.bf16.mxu0 %v2407_v9  ;;  %v2429_v24 = vld [vmem:[%s3657_s1 + $0x64] ss:$8 sps:$4 sm:$0xff]   ;;  %v2433_v26 = vld [vmem:[%s3657_s1 + $0x60] ss:$8 sps:$4 sm:$0xff]   ;;  %v2435_v28 = vld [vmem:[%s3657_s1 + $0x74] ss:$8 sps:$4 sm:$0xff]  }
   0xa   :  { %v2431_v25 = vld [vmem:[%s3657_s1 + $0x264] ss:$8 sps:$4 sm:$0xff]   ;;  %v2434_v27 = vld [vmem:[%s3657_s1 + $0x260] ss:$8 sps:$4 sm:$0xff]   ;;  %v2437_v29 = vld [vmem:[%s3657_s1 + $0x274] ss:$8 sps:$4 sm:$0xff]  }
   0xb   :  { %1888 = vmatpush1.bf16.msra.mxu1 %v2409_v10  ;;  %v2439_v30 = vld [vmem:[%s3657_s1 + $0x70] ss:$8 sps:$4 sm:$0xff]   ;;  %v2441_v32 = vld [vmem:[%s3657_s1 + $0x84] ss:$8 sps:$4 sm:$0xff]   ;;  %v2445_v34 = vld [vmem:[%s3657_s1 + $0x80] ss:$8 sps:$4 sm:$0xff]  }
   0xc   :  { %1970 = vmatpush1.bf16.msra.mxu0 %v2410_v11  ;;  %1889 = vmatprep.subr.bf16.mxu1 %v2411_v12  ;;  %v2440_v31 = vld [vmem:[%s3657_s1 + $0x270] ss:$8 sps:$4 sm:$0xff]   ;;  %v2443_v33 = vld [vmem:[%s3657_s1 + $0x284] ss:$8 sps:$4 sm:$0xff]   ;;  %v2446_v35 = vld [vmem:[%s3657_s1 + $0x280] ss:$8 sps:$4 sm:$0xff]  }
   0xd   :  { %1971 = vmatprep.subr.bf16.mxu0 %v2413_v13  ;;  %v2447_v36 = vld [vmem:[%s3657_s1 + $0x94] ss:$8 sps:$4 sm:$0xff]   ;;  %v2451_v38 = vld [vmem:[%s3657_s1 + $0x90] ss:$8 sps:$4 sm:$0xff]   ;;  %v2453_v40 = vld [vmem:[%s3657_s1 + $0xa4] ss:$8 sps:$4 sm:$0xff]  }
   0xe   :  { %v2449_v37 = vld [vmem:[%s3657_s1 + $0x294] ss:$8 sps:$4 sm:$0xff]   ;;  %v2452_v39 = vld [vmem:[%s3657_s1 + $0x290] ss:$8 sps:$4 sm:$0xff]   ;;  %v2455_v41 = vld [vmem:[%s3657_s1 + $0x2a4] ss:$8 sps:$4 sm:$0xff]  }
   0xf   :  { %1890 = vmatpush1.bf16.msra.mxu1 %v2415_v14  ;;  %v2457_v43 = vld [vmem:[%s3657_s1 + $0xa0] ss:$8 sps:$4 sm:$0xff]   ;;  %v2459_v45 = vld [vmem:[%s3657_s1 + $0xb4] ss:$8 sps:$4 sm:$0xff]   ;;  %v2463_v49 = vld [vmem:[%s3657_s1 + $0xb0] ss:$8 sps:$4 sm:$0xff]  }
  0x10   :  { %1972 = vmatpush1.bf16.msra.mxu0 %v2416_v15  ;;  %1891 = vmatprep.subr.bf16.mxu1 %v2417_v16  ;;  %v2458_v44 = vld [vmem:[%s3657_s1 + $0x2a0] ss:$8 sps:$4 sm:$0xff]   ;;  %v2461_v46 = vld [vmem:[%s3657_s1 + $0x2b4] ss:$8 sps:$4 sm:$0xff]   ;;  %v2464_v50 = vld [vmem:[%s3657_s1 + $0x2b0] ss:$8 sps:$4 sm:$0xff]  }
  0x11   :  { %1973 = vmatprep.subr.bf16.mxu0 %v2419_v17  ;;  %v2824_v51 = vshrl.u32 %v84_v42, 7  ;;  %v2465_v52 = vld [vmem:[%s3657_s1 + $0xc4] ss:$8 sps:$4 sm:$0xff]   ;;  %v15_v54 = vld [vmem:[%s3656_s0] ss:$8 sm:$0xf] }
  0x12   :  { %v2467_v53 = vld [vmem:[%s3657_s1 + $0x2c4] ss:$8 sps:$4 sm:$0xff]   ;;  %v16_v55 = vld [vmem:[%s3656_s0] ss:$8 sm:$0xf0] }
  0x13   :  { %1892 = vmatpush1.bf16.msra.mxu1 %v2421_v18  ;;  %v17_v56 = vor.u32 %v16_v55, %v15_v54  ;;  %v2118_v57 = vld [vmem:[%s3656_s0 + $0xa0] ss:$8 sm:$0xf]  ;;  %v2124_v60 = vld [vmem:[%s3656_s0 + $0x1] ss:$8 sm:$0xf]  ;;  %v2889_v15 = vsub.s32 %v83_v62, %v2824_v51 }
  0x14   :  { %1974 = vmatpush1.bf16.msra.mxu0 %v2422_v19  ;;  %1893 = vmatprep.subr.bf16.mxu1 %v2423_v20  ;;  %v2119_v58 = vld [vmem:[%s3656_s0 + $0xa0] ss:$8 sm:$0xf0]  ;;  %v2125_v61 = vld [vmem:[%s3656_s0 + $0x1] ss:$8 sm:$0xf0] }
  0x15   :  { %1975 = vmatprep.subr.bf16.mxu0 %v2425_v21  ;;  %v23_v59 = vor.u32 %v2119_v58, %v2118_v57  ;;  %v2469_v63 = vld [vmem:[%s3657_s1 + $0xc0] ss:$8 sps:$4 sm:$0xff]   ;;  %v2856_v1 = vor.u32 %v2125_v61, %v2124_v60  ;;  %v2471_v4 = vld [vmem:[%s3657_s1 + $0xd4] ss:$8 sps:$4 sm:$0xff]   ;;  %v2475_v19 = vld [vmem:[%s3657_s1 + $0xd0] ss:$8 sps:$4 sm:$0xff]  }
  0x16   :  { %v2470_v0 = vld [vmem:[%s3657_s1 + $0x2c0] ss:$8 sps:$4 sm:$0xff]   ;;  %v2473_v5 = vld [vmem:[%s3657_s1 + $0x2d4] ss:$8 sps:$4 sm:$0xff]   ;;  %v2476_v20 = vld [vmem:[%s3657_s1 + $0x2d0] ss:$8 sps:$4 sm:$0xff]  }
  0x17   :  { %1894 = vmatpush1.bf16.msra.mxu1 %v2427_v22  ;;  %v2127_v2 = vld [vmem:[%s3656_s0 + $0xa1] ss:$8 sm:$0xf]  ;;  %v30_v6 = vcombine.low %v17_v56, %v23_v59  ;;  %v2130_v8 = vld [vmem:[%s3656_s0 + $0x2] ss:$8 sm:$0xf]  ;;  %v31_v10 = vcombine.high %v17_v56, %v23_v59 }
  0x18   :  { %1976 = vmatpush1.bf16.msra.mxu0 %v2428_v23  ;;  %1895 = vmatprep.subr.bf16.mxu1 %v2429_v24  ;;  %v2128_v3 = vld [vmem:[%s3656_s0 + $0xa1] ss:$8 sm:$0xf0]  ;;  %v2131_v9 = vld [vmem:[%s3656_s0 + $0x2] ss:$8 sm:$0xf0] }
  0x19   :  { %1977 = vmatprep.subr.bf16.mxu0 %v2431_v25  ;;  %v2870_v7 = vor.u32 %v2128_v3, %v2127_v2  ;;  %v2878_v11 = vor.u32 %v2131_v9, %v2130_v8  ;;  %v2133_v12 = vld [vmem:[%s3656_s0 + $0xa2] ss:$8 sm:$0xf]  ;;  %2121 = vst.sshfl [vmem:[#allocation2] sm:$0xff pattern:$0x75316420] %v30_v6 }
  0x1a   :  { %v2134_v13 = vld [vmem:[%s3656_s0 + $0xa2] ss:$8 sm:$0xf0]  ;;  %v2136_v17 = vld [vmem:[%s3656_s0 + $0x3] ss:$8 sm:$0xf] }
  0x1b   :  { %1896 = vmatpush1.bf16.msra.mxu1 %v2433_v26  ;;  %v79_v14 = vcombine.low %v2856_v1, %v2870_v7  ;;  %v2891_v16 = vor.u32 %v2134_v13, %v2133_v12  ;;  %v2137_v18 = vld [vmem:[%s3656_s0 + $0x3] ss:$8 sm:$0xf0]  ;;  %2122 = vst.sshfl [vmem:[#allocation2 + $0x8] sm:$0xff pattern:$0x75316420] %v31_v10 }
  0x1c   :  { %1978 = vmatpush1.bf16.msra.mxu0 %v2434_v27  ;;  %1897 = vmatprep.subr.bf16.mxu1 %v2435_v28  ;;  %v2905_v21 = vor.u32 %v2137_v18, %v2136_v17  ;;  %v2139_v22 = vld [vmem:[%s3656_s0 + $0xa3] ss:$8 sm:$0xf]  ;;  %v2477_v24 = vld [vmem:[%s3657_s1 + $0xe4] ss:$8 sps:$4 sm:$0xff]  }
  0x1d   :  { %1979 = vmatprep.subr.bf16.mxu0 %v2437_v29  ;;  %v2140_v23 = vld [vmem:[%s3656_s0 + $0xa3] ss:$8 sm:$0xf0]  ;;  %v2479_v25 = vld [vmem:[%s3657_s1 + $0x2e4] ss:$8 sps:$4 sm:$0xff]   ;;  %v131_v26 = vcombine.low %v2878_v11, %v2891_v16 }
  0x1e   :  { %v2921_v27 = vor.u32 %v2140_v23, %v2139_v22  ;;  %v2142_v28 = vld [vmem:[%s3656_s0 + $0x4] ss:$8 sm:$0xf]  ;;  %v2152_v42 = vld [vmem:[%s3656_s0 + $0xa5] ss:$8 sm:$0xf0] }
  0x1f   :  { %1898 = vmatpush1.bf16.msra.mxu1 %v2439_v30  ;;  %v2143_v29 = vld [vmem:[%s3656_s0 + $0x4] ss:$8 sm:$0xf0]  ;;  %v2154_v48 = vld [vmem:[%s3656_s0 + $0x6] ss:$8 sm:$0xf] }
  0x20   :  { %1980 = vmatpush1.bf16.msra.mxu0 %v2440_v31  ;;  %1899 = vmatprep.subr.bf16.mxu1 %v2441_v32  ;;  %v2929_v30 = vor.u32 %v2143_v29, %v2142_v28  ;;  %v2145_v31 = vld [vmem:[%s3656_s0 + $0xa4] ss:$8 sm:$0xf]  ;;  %v2158_v57 = vld [vmem:[%s3656_s0 + $0xa6] ss:$8 sm:$0xf0] }
  0x21   :  { %1981 = vmatprep.subr.bf16.mxu0 %v2443_v33  ;;  %v2146_v32 = vld [vmem:[%s3656_s0 + $0xa4] ss:$8 sm:$0xf0]  ;;  %v87_v33 = vrot.slane %v79_v14, %v2889_v15  ;;  %v2160_v58 = vld [vmem:[%s3656_s0 + $0x7] ss:$8 sm:$0xf] }
  0x22   :  { %v2487_v59 = vld [vmem:[%s3657_s1 + $0xf0] ss:$8 sps:$4 sm:$0xff]   ;;  %v2161_v62 = vld [vmem:[%s3656_s0 + $0x7] ss:$8 sm:$0xf0] }
  0x23   :  { %1900 = vmatpush1.bf16.msra.mxu1 %v2445_v34  ;;  %v183_v34 = vcombine.low %v2905_v21, %v2921_v27  ;;  %v2488_v60 = vld [vmem:[%s3657_s1 + $0x2f0] ss:$8 sps:$4 sm:$0xff]   ;;  %v3008_v3 = vor.u32 %v2161_v62, %v2160_v58  ;;  %v80_v58 = vcombine.high %v2856_v1, %v2870_v7  ;;  %v2197_v1 = vld [vmem:[%s3656_s0 + $0x55] ss:$8 sm:$0xf0] }
  0x24   :  { %1982 = vmatpush1.bf16.msra.mxu0 %v2446_v35  ;;  %1901 = vmatprep.subr.bf16.mxu1 %v2447_v36  ;;  %v2940_v35 = vor.u32 %v2146_v32, %v2145_v31  ;;  %v2148_v36 = vld [vmem:[%s3656_s0 + $0x5] ss:$8 sm:$0xf]  ;;  %v2167_v9 = vld [vmem:[%s3656_s0 + $0x50] ss:$8 sm:$0xf0] }
  0x25   :  { %1983 = vmatprep.subr.bf16.mxu0 %v2449_v37  ;;  %v2149_v37 = vld [vmem:[%s3656_s0 + $0x5] ss:$8 sm:$0xf0]  ;;  %v191_v55 = vrot.slane %v183_v34, %v2889_v15  ;;  %v2169_v10 = vld [vmem:[%s3656_s0 + $0xf0] ss:$8 sm:$0xf] }
  0x26   :  { %v2170_v17 = vld [vmem:[%s3656_s0 + $0xf0] ss:$8 sm:$0xf0]  ;;  %v2172_v18 = vld [vmem:[%s3656_s0 + $0x51] ss:$8 sm:$0xf] }
  0x27   :  { %1902 = vmatpush1.bf16.msra.mxu1 %v2451_v38  ;;  %v2481_v38 = vld [vmem:[%s3657_s1 + $0xe0] ss:$8 sps:$4 sm:$0xff]   ;;  %v2199_v7 = vld [vmem:[%s3656_s0 + $0xf5] ss:$8 sm:$0xf] }
  0x28   :  { %1984 = vmatpush1.bf16.msra.mxu0 %v2452_v39  ;;  %1903 = vmatprep.subr.bf16.mxu1 %v2453_v40  ;;  %v2482_v39 = vld [vmem:[%s3657_s1 + $0x2e0] ss:$8 sps:$4 sm:$0xff]   ;;  %v2954_v40 = vor.u32 %v2149_v37, %v2148_v36 }
  0x29   :  { %1985 = vmatprep.subr.bf16.mxu0 %v2455_v41  ;;  %v2151_v41 = vld [vmem:[%s3656_s0 + $0xa5] ss:$8 sm:$0xf]  ;;  %v2173_v22 = vld [vmem:[%s3656_s0 + $0x51] ss:$8 sm:$0xf0] }
  0x2a   :  { %v2971_v47 = vor.u32 %v2152_v42, %v2151_v41  ;;  %v2175_v23 = vld [vmem:[%s3656_s0 + $0xf1] ss:$8 sm:$0xf]  ;;  %v2178_v29 = vld [vmem:[%s3656_s0 + $0x52] ss:$8 sm:$0xf] }
  0x2b   :  { %1904 = vmatpush1.bf16.msra.mxu1 %v2457_v43  ;;  %v2483_v43 = vld [vmem:[%s3657_s1 + $0xf4] ss:$8 sps:$4 sm:$0xff]   ;;  %v2176_v28 = vld [vmem:[%s3656_s0 + $0xf1] ss:$8 sm:$0xf0] }
  0x2c   :  { %1986 = vmatpush1.bf16.msra.mxu0 %v2458_v44  ;;  %1905 = vmatprep.subr.bf16.mxu1 %v2459_v45  ;;  %v2485_v44 = vld [vmem:[%s3657_s1 + $0x2f4] ss:$8 sps:$4 sm:$0xff]   ;;  %v139_v45 = vrot.slane %v131_v26, %v2889_v15  ;;  %v287_v56 = vcombine.low %v2954_v40, %v2971_v47  ;;  %v3046_v26 = vor.u32 %v2173_v22, %v2172_v18  ;;  %v2181_v34 = vld [vmem:[%s3656_s0 + $0xf2] ss:$8 sm:$0xf] }
  0x2d   :  { %1987 = vmatprep.subr.bf16.mxu0 %v2461_v46  ;;  %v235_v46 = vcombine.low %v2929_v30, %v2940_v35  ;;  %v3056_v32 = vor.u32 %v2176_v28, %v2175_v23  ;;  %v2184_v41 = vld [vmem:[%s3656_s0 + $0x53] ss:$8 sm:$0xf]  ;;  %v94_v22 = vrot.slane %v80_v58, %v2889_v15  ;;  %v2494_v58 = vld [vmem:[%s3657_s1 + $0x304] ss:$8 sps:$4 sm:$0xff]  }
  0x2e   :  { %v295_v13 = vrot.slane %v287_v56, %v2889_v15  ;;  %v2191_v56 = vld [vmem:[%s3656_s0 + $0x54] ss:$8 sm:$0xf0] }
  0x2f   :  { %1906 = vmatpush1.bf16.msra.mxu1 %v2463_v49  ;;  %v2155_v49 = vld [vmem:[%s3656_s0 + $0x6] ss:$8 sm:$0xf0]  ;;  %v243_v2 = vrot.slane %v235_v46, %v2889_v15  ;;  %v495_v42 = vcombine.low %v3046_v26, %v3056_v32 }
  0x30   :  { %1988 = vmatpush1.bf16.msra.mxu0 %v2464_v50  ;;  %1907 = vmatprep.subr.bf16.mxu1 %v2465_v52  ;;  %v60_v50 = vld [vmem:[#allocation2] sm:$0xff]  ;;  %v2979_v52 = vor.u32 %v2155_v49, %v2154_v48 }
  0x31   :  { %1989 = vmatprep.subr.bf16.mxu0 %v2467_v53  ;;  %v2157_v53 = vld [vmem:[%s3656_s0 + $0xa6] ss:$8 sm:$0xf]  ;;  %v106_v54 = vadd.f32 %v87_v33, %v60_v50  ;;  %v2179_v33 = vld [vmem:[%s3656_s0 + $0x52] ss:$8 sm:$0xf0] }
  0x32   :  { %v2999_v61 = vor.u32 %v2158_v57, %v2157_v53  ;;  %v2188_v50 = vld [vmem:[%s3656_s0 + $0xf3] ss:$8 sm:$0xf0]  ;;  %v2190_v53 = vld [vmem:[%s3656_s0 + $0x54] ss:$8 sm:$0xf] }
  0x33   :  { %1908 = vmatpush1.bf16.msra.mxu1 %v2469_v63  ;;  %v2163_v63 = vld [vmem:[%s3656_s0 + $0xa7] ss:$8 sm:$0xf]  ;;  %v2193_v57 = vld [vmem:[%s3656_s0 + $0xf4] ss:$8 sm:$0xf]  ;;  %v3105_v62 = vor.u32 %v2191_v56, %v2190_v53 }
  0x34   :  { %1990 = vmatpush1.bf16.msra.mxu0 %v2470_v0  ;;  %1909 = vmatprep.subr.bf16.mxu1 %v2471_v4  ;;  %v158_v0 = vadd.f32 %v139_v45, %v106_v54  ;;  %v2164_v4 = vld [vmem:[%s3656_s0 + $0xa7] ss:$8 sm:$0xf0]  ;;  %v339_v6 = vcombine.low %v2979_v52, %v2999_v61  ;;  %v2187_v45 = vld [vmem:[%s3656_s0 + $0xf3] ss:$8 sm:$0xf] }
  0x35   :  { %1991 = vmatprep.subr.bf16.mxu0 %v2473_v5  ;;  %v2166_v5 = vld [vmem:[%s3656_s0 + $0x50] ss:$8 sm:$0xf]  ;;  %v3018_v8 = vor.u32 %v2164_v4, %v2163_v63  ;;  %v2194_v63 = vld [vmem:[%s3656_s0 + $0xf4] ss:$8 sm:$0xf0] }
  0x36   :  { %v210_v12 = vadd.f32 %v191_v55, %v158_v0  ;;  %v3027_v14 = vor.u32 %v2167_v9, %v2166_v5  ;;  %v3094_v55 = vor.u32 %v2188_v50, %v2187_v45  ;;  %v2196_v0 = vld [vmem:[%s3656_s0 + $0x55] ss:$8 sm:$0xf]  ;;  %v3115_v4 = vor.u32 %v2194_v63, %v2193_v57 }
  0x37   :  { %1910 = vmatpush1.bf16.msra.mxu1 %v2475_v19  ;;  %v391_v19 = vcombine.low %v3008_v3, %v3018_v8  ;;  %v132_v5 = vcombine.high %v2878_v11, %v2891_v16  ;;  %v2203_v16 = vld [vmem:[%s3656_s0 + $0x56] ss:$8 sm:$0xf0]  ;;  %v288_v50 = vcombine.high %v2954_v40, %v2971_v47  ;;  %v2658_v56 = vmov 1983009808  }
  0x38   :  { %1992 = vmatpush1.bf16.msra.mxu0 %v2476_v20  ;;  %1911 = vmatprep.subr.bf16.mxu1 %v2477_v24  ;;  %v3037_v20 = vor.u32 %v2170_v17, %v2169_v10  ;;  %v262_v24 = vadd.f32 %v243_v2, %v210_v12  ;;  %v3126_v10 = vor.u32 %v2197_v1, %v2196_v0  ;;  %v2200_v12 = vld [vmem:[%s3656_s0 + $0xf5] ss:$8 sm:$0xf0]  ;;  %v851_v57 = vunpack.c.l.s4 %v2658_v56 }
  0x39   :  { %1993 = vmatprep.subr.bf16.mxu0 %v2479_v25  ;;  %v347_v25 = vrot.slane %v339_v6, %v2889_v15  ;;  %v399_v37 = vrot.slane %v391_v19, %v2889_v15  ;;  %v184_v17 = vcombine.high %v2905_v21, %v2921_v27  ;;  %v651_v18 = vcombine.low %v3105_v62, %v3115_v4  ;;  %v2205_v19 = vld [vmem:[%s3656_s0 + $0xf6] ss:$8 sm:$0xf]  ;;  %v2208_v27 = vld [vmem:[%s3656_s0 + $0x57] ss:$8 sm:$0xf] }
  0x3a   :  { %v443_v31 = vcombine.low %v3027_v14, %v3037_v20  ;;  %v314_v36 = vadd.f32 %v295_v13, %v262_v24  ;;  %v2202_v13 = vld [vmem:[%s3656_s0 + $0x56] ss:$8 sm:$0xf]  ;;  %v3138_v11 = vor.u32 %v2200_v12, %v2199_v7  ;;  %v340_v0 = vcombine.high %v2979_v52, %v2999_v61 }
  0x3b   :  { %1912 = vmatpush1.bf16.msra.mxu1 %v2481_v38  ;;  %v3065_v38 = vor.u32 %v2179_v33, %v2178_v29  ;;  %v2206_v21 = vld [vmem:[%s3656_s0 + $0xf6] ss:$8 sm:$0xf0]  ;;  %v2211_v33 = vld [vmem:[%s3656_s0 + $0xf7] ss:$8 sm:$0xf]  ;;  %v198_v45 = vrot.slane %v184_v17, %v2889_v15  ;;  %v302_v1 = vrot.slane %v288_v50, %v2889_v15  ;;  %v392_v7 = vcombine.high %v3008_v3, %v3018_v8 }
  0x3c   :  { %1994 = vmatpush1.bf16.msra.mxu0 %v2482_v39  ;;  %1913 = vmatprep.subr.bf16.mxu1 %v2483_v43  ;;  %v2182_v39 = vld [vmem:[%s3656_s0 + $0xf2] ss:$8 sm:$0xf0]  ;;  %v366_v46 = vadd.f32 %v347_v25, %v314_v36  ;;  %v451_v48 = vrot.slane %v443_v31, %v2889_v15  ;;  %v3148_v25 = vor.u32 %v2203_v16, %v2202_v13  ;;  %v2209_v31 = vld [vmem:[%s3656_s0 + $0x57] ss:$8 sm:$0xf0] }
  0x3d   :  { %1995 = vmatprep.subr.bf16.mxu0 %v2485_v44  ;;  %v3075_v43 = vor.u32 %v2182_v39, %v2181_v34  ;;  %v2185_v44 = vld [vmem:[%s3656_s0 + $0x53] ss:$8 sm:$0xf0]  ;;  %v703_v28 = vcombine.low %v3126_v10, %v3138_v11  ;;  %v3158_v29 = vor.u32 %v2206_v21, %v2205_v19  ;;  %v146_v34 = vrot.slane %v132_v5, %v2889_v15 }
  0x3e   :  { %v3084_v49 = vor.u32 %v2185_v44, %v2184_v41  ;;  %v236_v36 = vcombine.high %v2929_v30, %v2940_v35  ;;  %v659_v39 = vrot.slane %v651_v18, %v2889_v15  ;;  %v3170_v41 = vor.u32 %v2209_v31, %v2208_v27  ;;  %v61_v44 = vld [vmem:[#allocation2 + $0x8] sm:$0xff] }
  0x3f   :  { %1914 = vmatpush1.bf16.msra.mxu1 %v2487_v59  ;;  %v547_v54 = vcombine.low %v3065_v38, %v3075_v43  ;;  %v418_v59 = vadd.f32 %v399_v37, %v366_v46  ;;  %v755_v46 = vcombine.low %v3148_v25, %v3158_v29  ;;  %v2491_v30 = vld [vmem:[%s3657_s1 + $0x104] ss:$8 sps:$4 sm:$0xff]   ;;  %v107_v35 = vadd.f32 %v94_v22, %v61_v44  ;;  %v2497_v44 = vld [vmem:[%s3657_s1 + $0x114] ss:$8 sps:$4 sm:$0xff]  }
  0x40   :  { %1996 = vmatpush1.bf16.msra.mxu0 %v2488_v60  ;;  %v503_v60 = vrot.slane %v495_v42, %v2889_v15  ;;  %v599_v2 = vcombine.low %v3084_v49, %v3094_v55  ;;  %v2212_v42 = vld [vmem:[%s3656_s0 + $0xf7] ss:$8 sm:$0xf0]  ;;  %1924 = vmatprep.subr.bf16.mxu1 %v2491_v30  ;;  %v250_v63 = vrot.slane %v236_v36, %v2889_v15  ;;  %v2495_v30 = vld [vmem:[%s3657_s1 + $0x110] ss:$8 sps:$4 sm:$0xff]  }
  0x41   :  { %v470_v6 = vadd.f32 %v451_v48, %v418_v59  ;;  %v555_v9 = vrot.slane %v547_v54, %v2889_v15  ;;  %v3178_v48 = vor.u32 %v2212_v42, %v2211_v33  ;;  %v711_v54 = vrot.slane %v703_v28, %v2889_v15  ;;  %2006 = vmatprep.subr.bf16.mxu0 %v2494_v58 }
  0x42   :  { %v607_v24 = vrot.slane %v599_v2, %v2889_v15  ;;  %v763_v47 = vrot.slane %v755_v46, %v2889_v15  ;;  %v354_v13 = vrot.slane %v340_v0, %v2889_v15  ;;  %v444_v52 = vcombine.high %v3027_v14, %v3037_v20  ;;  %v2513_v0 = vld [vmem:[%s3657_s1 + $0x140] ss:$8 sps:$4 sm:$0xff]  }
  0x43   :  { %v522_v23 = vadd.f32 %v503_v60, %v470_v6  ;;  %v807_v59 = vcombine.low %v3170_v41, %v3178_v48  ;;  %v159_v60 = vadd.f32 %v146_v34, %v107_v35  ;;  %v406_v18 = vrot.slane %v392_v7, %v2889_v15  ;;  %v2503_v35 = vld [vmem:[%s3657_s1 + $0x124] ss:$8 sps:$4 sm:$0xff]  }
  0x44   :  { %v496_v16 = vcombine.high %v3046_v26, %v3056_v32  ;;  %v458_v22 = vrot.slane %v444_v52, %v2889_v15  ;;  %v600_v21 = vcombine.high %v3084_v49, %v3094_v55  ;;  %v652_v31 = vcombine.high %v3105_v62, %v3115_v4 }
  0x45   :  { %v574_v37 = vadd.f32 %v555_v9, %v522_v23  ;;  %v211_v2 = vadd.f32 %v198_v45, %v159_v60  ;;  %v815_v6 = vrot.slane %v807_v59, %v2889_v15  ;;  %v852_v9 = vunpack.c.0.s8 %v851_v57  ;;  %v2507_v57 = vld [vmem:[%s3657_s1 + $0x130] ss:$8 sps:$4 sm:$0xff]   ;;  %v2515_v59 = vld [vmem:[%s3657_s1 + $0x144] ss:$8 sps:$4 sm:$0xff]  }
  0x46   :  { %v548_v23 = vcombine.high %v3065_v38, %v3075_v43  ;;  %v510_v20 = vrot.slane %v496_v16, %v2889_v15  ;;  %v614_v34 = vrot.slane %v600_v21, %v2889_v15  ;;  %v704_v36 = vcombine.high %v3126_v10, %v3138_v11  ;;  %v2533_v16 = vld [vmem:[%s3657_s1 + $0x174] ss:$8 sps:$4 sm:$0xff]  }
  0x47   :  { %v626_v53 = vadd.f32 %v607_v24, %v574_v37  ;;  %v263_v12 = vadd.f32 %v250_v63, %v211_v2  ;;  %v3206_v3 = vsub.s32 %v852_v9, %v2824_v51  ;;  %v2489_v37 = vld [vmem:[%s3657_s1 + $0x100] ss:$8 sps:$4 sm:$0xff]   ;;  %v666_v4 = vrot.slane %v652_v31, %v2889_v15  ;;  %v2500_v9 = vld [vmem:[%s3657_s1 + $0x314] ss:$8 sps:$4 sm:$0xff]   ;;  %v2522_v31 = vld [vmem:[%s3657_s1 + $0x350] ss:$8 sps:$4 sm:$0xff]  }
  0x48   :  { %v562_v28 = vrot.slane %v548_v23, %v2889_v15  ;;  %v756_v42 = vcombine.high %v3148_v25, %v3158_v29  ;;  %v718_v45 = vrot.slane %v704_v36, %v2889_v15  ;;  %v808_v46 = vcombine.high %v3170_v41, %v3178_v48  ;;  %v2501_v41 = vld [vmem:[%s3657_s1 + $0x120] ss:$8 sps:$4 sm:$0xff]   ;;  %v2539_v23 = vld [vmem:[%s3657_s1 + $0x184] ss:$8 sps:$4 sm:$0xff]   ;;  %v2545_v21 = vld [vmem:[%s3657_s1 + $0x194] ss:$8 sps:$4 sm:$0xff]  }
  0x49   :  { %v678_v40 = vadd.f32 %v659_v39, %v626_v53  ;;  %v315_v17 = vadd.f32 %v302_v1, %v263_v12  ;;  %v2519_v12 = vld [vmem:[%s3657_s1 + $0x150] ss:$8 sps:$4 sm:$0xff]   ;;  %v2528_v36 = vld [vmem:[%s3657_s1 + $0x360] ss:$8 sps:$4 sm:$0xff]  }
  0x4a   :  { %v770_v29 = vrot.slane %v756_v42, %v2889_v15  ;;  %v822_v53 = vrot.slane %v808_v46, %v2889_v15  ;;  %v2569_v46 = vld [vmem:[%s3657_s1 + $0x1d4] ss:$8 sps:$4 sm:$0xff]  }
  0x4b   :  { %v730_v5 = vadd.f32 %v711_v54, %v678_v40  ;;  %v367_v8 = vadd.f32 %v354_v13, %v315_v17  ;;  %v2509_v54 = vld [vmem:[%s3657_s1 + $0x134] ss:$8 sps:$4 sm:$0xff]   ;;  %v2527_v13 = vld [vmem:[%s3657_s1 + $0x164] ss:$8 sps:$4 sm:$0xff]  }
  0x4c   :  { %v2506_v17 = vld [vmem:[%s3657_s1 + $0x324] ss:$8 sps:$4 sm:$0xff]  }
  0x4d   :  { %v782_v61 = vadd.f32 %v763_v47, %v730_v5  ;;  %v419_v14 = vadd.f32 %v406_v18, %v367_v8  ;;  %v2521_v47 = vld [vmem:[%s3657_s1 + $0x154] ss:$8 sps:$4 sm:$0xff]   ;;  %v2492_v5 = vld [vmem:[%s3657_s1 + $0x300] ss:$8 sps:$4 sm:$0xff]  }
  0x4e   :  { %v2525_v18 = vld [vmem:[%s3657_s1 + $0x160] ss:$8 sps:$4 sm:$0xff]   ;;  %v2512_v8 = vld [vmem:[%s3657_s1 + $0x334] ss:$8 sps:$4 sm:$0xff]  }
  0x4f   :  { %v834_v19 = vadd.f32 %v815_v6, %v782_v61  ;;  %v471_v32 = vadd.f32 %v458_v22, %v419_v14  ;;  %v2498_v61 = vld [vmem:[%s3657_s1 + $0x310] ss:$8 sps:$4 sm:$0xff]   ;;  %v2518_v14 = vld [vmem:[%s3657_s1 + $0x344] ss:$8 sps:$4 sm:$0xff]  }
  0x50   :  { %v2531_v22 = vld [vmem:[%s3657_s1 + $0x170] ss:$8 sps:$4 sm:$0xff]  }
  0x51   :  { %837 = vst [vmem:[#allocation2] sm:$0xff] %v834_v19  ;;  %v843_v24 = vmul.f32 0.0625, %v834_v19  ;;  %v523_v43 = vadd.f32 %v510_v20, %v471_v32  ;;  %v2504_v19 = vld [vmem:[%s3657_s1 + $0x320] ss:$8 sps:$4 sm:$0xff]   ;;  %v2543_v32 = vld [vmem:[%s3657_s1 + $0x190] ss:$8 sps:$4 sm:$0xff]  }
  0x52   :  { %v2537_v20 = vld [vmem:[%s3657_s1 + $0x180] ss:$8 sps:$4 sm:$0xff]  }
  0x53   :  { %v849_v27 = vcombine.high %v843_v24, %v843_v24  ;;  %v856_v26 = vrot.slane %v843_v24, %v3206_v3  ;;  %v575_v62 = vadd.f32 %v562_v28, %v523_v43  ;;  %v2510_v24 = vld [vmem:[%s3657_s1 + $0x330] ss:$8 sps:$4 sm:$0xff]   ;;  %v2551_v28 = vld [vmem:[%s3657_s1 + $0x1a4] ss:$8 sps:$4 sm:$0xff]   ;;  %v2549_v43 = vld [vmem:[%s3657_s1 + $0x1a0] ss:$8 sps:$4 sm:$0xff]  }
  0x55   :  { %v864_v33 = vcombine.high %v856_v26, %v856_v26  ;;  %v3219_v38 = vrot.slane %v849_v27, %v3206_v3  ;;  %v901_v49 = vpack.c.bf16 %v856_v26, %v856_v26  ;;  %v627_v11 = vadd.f32 %v614_v34, %v575_v62  ;;  %v2516_v27 = vld [vmem:[%s3657_s1 + $0x340] ss:$8 sps:$4 sm:$0xff]   ;;  %v2524_v26 = vld [vmem:[%s3657_s1 + $0x354] ss:$8 sps:$4 sm:$0xff]  }
  0x56   :  { %v2557_v34 = vld [vmem:[%s3657_s1 + $0x1b4] ss:$8 sps:$4 sm:$0xff]   ;;  %v2117_v62 = vld [vmem:[%s3656_s0 + $0x40] ss:$8 sm:$0x3] }
  0x57   :  { %v902_v55 = vpack.c.bf16 %v864_v33, %v864_v33  ;;  %v865_v39 = vcombine.high %v3219_v38, %v3219_v38  ;;  %v679_v25 = vadd.f32 %v666_v4, %v627_v11  ;;  %v2530_v33 = vld [vmem:[%s3657_s1 + $0x364] ss:$8 sps:$4 sm:$0xff]   ;;  %v2120_v4 = vld [vmem:[%s3656_s0 + $0xe0] ss:$8 sm:$0x3] }
  0x58   :  { %v46_v42 = vcombine.low %v2117_v62, %v2120_v4  ;;  %v2542_v11 = vld [vmem:[%s3657_s1 + $0x384] ss:$8 sps:$4 sm:$0xff]  }
  0x59   :  { %1915 = vmatprep.mubr.bf16.mxu1 %v902_v55  ;;  %v904_v10 = vpack.c.bf16 %v865_v39, %v865_v39  ;;  %v731_v50 = vadd.f32 %v718_v45, %v679_v25  ;;  %v2555_v55 = vld [vmem:[%s3657_s1 + $0x1b0] ss:$8 sps:$4 sm:$0xff]   ;;  %v2563_v39 = vld [vmem:[%s3657_s1 + $0x1c4] ss:$8 sps:$4 sm:$0xff]   ;;  %v2561_v45 = vld [vmem:[%s3657_s1 + $0x1c0] ss:$8 sps:$4 sm:$0xff]  }
  0x5a   :  { %1916 = vmatmul.mubr.bf16.vlgmr.msra.gmra.mrb[0].mxu1 %v901_v49  ;;  %v2536_v49 = vld [vmem:[%s3657_s1 + $0x374] ss:$8 sps:$4 sm:$0xff]   ;;  %2123 = vst.sshfl [vmem:[#allocation2 + $0x10] sm:$0x33 pattern:$0x75316420] %v46_v42 }
  0x5b   :  { %1925 = vmatpush1.bf16.msra.mxu1 %v2489_v37  ;;  %1956 = vmatprep.mubr.bf16.mxu1 %v904_v10  ;;  %v783_v48 = vadd.f32 %v770_v29, %v731_v50  ;;  %v2534_v37 = vld [vmem:[%s3657_s1 + $0x370] ss:$8 sps:$4 sm:$0xff]   ;;  %v2129_v10 = vld [vmem:[%s3656_s0 + $0xe1] ss:$8 sm:$0x3] }
  0x5c   :  { %1926 = vmatprep.subr.bf16.mxu1 %v2497_v44  ;;  %v2126_v44 = vld [vmem:[%s3656_s0 + $0x41] ss:$8 sm:$0x3]  ;;  %v2548_v29 = vld [vmem:[%s3657_s1 + $0x394] ss:$8 sps:$4 sm:$0xff]  }
  0x5d   :  { %v835_v56 = vadd.f32 %v822_v53, %v783_v48  ;;  %v2540_v25 = vld [vmem:[%s3657_s1 + $0x380] ss:$8 sps:$4 sm:$0xff]   ;;  %v2575_v50 = vld [vmem:[%s3657_s1 + $0x1e4] ss:$8 sps:$4 sm:$0xff]  }
  0x5e   :  { %v2554_v48 = vld [vmem:[%s3657_s1 + $0x3a4] ss:$8 sps:$4 sm:$0xff]  }
  0x5f   :  { %1927 = vmatpush1.bf16.msra.mxu1 %v2495_v30  ;;  %838 = vst [vmem:[#allocation2 + $0x8] sm:$0xff] %v835_v56  ;;  %v844_v58 = vmul.f32 0.0625, %v835_v56  ;;  %v95_v30 = vcombine.low %v2126_v44, %v2129_v10  ;;  %v2132_v56 = vld [vmem:[%s3656_s0 + $0x42] ss:$8 sm:$0x3] }
  0x60   :  { %1928 = vmatprep.subr.bf16.mxu1 %v2503_v35  ;;  %v2567_v35 = vld [vmem:[%s3657_s1 + $0x1d0] ss:$8 sps:$4 sm:$0xff]  }
  0x61   :  { %v866_v60 = vcombine.high %v844_v58, %v844_v58  ;;  %v873_v63 = vrot.slane %v844_v58, %v3206_v3  ;;  %v102_v53 = vrot.slane %v95_v30, %v2889_v15  ;;  %v2135_v58 = vld [vmem:[%s3656_s0 + $0xe2] ss:$8 sm:$0x3] }
  0x63   :  { %1929 = vmatpush1.bf16.msra.mxu1 %v2501_v41  ;;  %v881_v40 = vcombine.high %v873_v63, %v873_v63  ;;  %v3266_v2 = vrot.slane %v866_v60, %v3206_v3  ;;  %v905_v1 = vpack.c.bf16 %v873_v63, %v873_v63  ;;  %v2546_v41 = vld [vmem:[%s3657_s1 + $0x390] ss:$8 sps:$4 sm:$0xff]   ;;  %v2552_v63 = vld [vmem:[%s3657_s1 + $0x3a0] ss:$8 sps:$4 sm:$0xff]  }
  0x64   :  { %1930 = vmatprep.subr.bf16.mxu1 %v2509_v54  ;;  %v2573_v54 = vld [vmem:[%s3657_s1 + $0x1e0] ss:$8 sps:$4 sm:$0xff]  }
  0x65   :  { %v906_v7 = vpack.c.bf16 %v881_v40, %v881_v40  ;;  %v882_v6 = vcombine.high %v3266_v2, %v3266_v2  ;;  %v2560_v40 = vld [vmem:[%s3657_s1 + $0x3b4] ss:$8 sps:$4 sm:$0xff]  }
  0x67   :  { %1931 = vmatpush1.bf16.msra.mxu1 %v2507_v57  ;;  %1997 = vmatprep.mubr.bf16.mxu0 %v906_v7  ;;  %v908_v52 = vpack.c.bf16 %v882_v6, %v882_v6  ;;  %v62_v57 = vld [vmem:[#allocation2 + $0x10] sm:$0xf] }
  0x68   :  { %1932 = vmatprep.subr.bf16.mxu1 %v2515_v59  ;;  %1998 = vmatmul.mubr.bf16.vlgmr.msra.gmra.mrb[0].mxu0 %v905_v1  ;;  %v2581_v59 = vld [vmem:[%s3657_s1 + $0x1f4] ss:$8 sps:$4 sm:$0xff]   ;;  %v108_v60 = vadd.f32 %v102_v53, %v62_v57 }
  0x69   :  { %2007 = vmatpush1.bf16.msra.mxu0 %v2492_v5  ;;  %2038 = vmatprep.mubr.bf16.mxu0 %v908_v52 }
  0x6a   :  { %2008 = vmatprep.subr.bf16.mxu0 %v2500_v9  ;;  %111 = vst [vmem:[#allocation2 + $0x10] sm:$0xf] %v108_v60 }
  0x6b   :  { %1933 = vmatpush1.bf16.msra.mxu1 %v2513_v0  ;;  %v147_v0 = vcombine.low %v2132_v56, %v2135_v58 }
  0x6c   :  { %1934 = vmatprep.subr.bf16.mxu1 %v2521_v47  ;;  %v2579_v47 = vld [vmem:[%s3657_s1 + $0x1f0] ss:$8 sps:$4 sm:$0xff]  }
  0x6d   :  { %2009 = vmatpush1.bf16.msra.mxu0 %v2498_v61 }
  0x6e   :  { %2010 = vmatprep.subr.bf16.mxu0 %v2506_v17 }
  0x6f   :  { %1935 = vmatpush1.bf16.msra.mxu1 %v2519_v12 }
  0x70   :  { %1936 = vmatprep.subr.bf16.mxu1 %v2527_v13 }
  0x71   :  { %2011 = vmatpush1.bf16.msra.mxu0 %v2504_v19 }
  0x72   :  { %2012 = vmatprep.subr.bf16.mxu0 %v2512_v8 }
  0x73   :  { %1937 = vmatpush1.bf16.msra.mxu1 %v2525_v18 }
  0x74   :  { %1938 = vmatprep.subr.bf16.mxu1 %v2533_v16 }
  0x75   :  { %2013 = vmatpush1.bf16.msra.mxu0 %v2510_v24 }
  0x76   :  { %2014 = vmatprep.subr.bf16.mxu0 %v2518_v14 }
  0x77   :  { %1939 = vmatpush1.bf16.msra.mxu1 %v2531_v22 }
  0x78   :  { %1940 = vmatprep.subr.bf16.mxu1 %v2539_v23 }
  0x79   :  { %2015 = vmatpush1.bf16.msra.mxu0 %v2516_v27 }
  0x7a   :  { %2016 = vmatprep.subr.bf16.mxu0 %v2524_v26 }
  0x7b   :  { %1941 = vmatpush1.bf16.msra.mxu1 %v2537_v20 }
  0x7c   :  { %1942 = vmatprep.subr.bf16.mxu1 %v2545_v21 }
  0x7d   :  { %2017 = vmatpush1.bf16.msra.mxu0 %v2522_v31 }
  0x7e   :  { %2018 = vmatprep.subr.bf16.mxu0 %v2530_v33 }
  0x7f   :  { %1943 = vmatpush1.bf16.msra.mxu1 %v2543_v32 }
  0x80   :  { %1944 = vmatprep.subr.bf16.mxu1 %v2551_v28 }
  0x81   :  { %2019 = vmatpush1.bf16.msra.mxu0 %v2528_v36 }
  0x82   :  { %2020 = vmatprep.subr.bf16.mxu0 %v2536_v49 }
  0x83   :  { %1945 = vmatpush1.bf16.msra.mxu1 %v2549_v43 }
  0x84   :  { %1946 = vmatprep.subr.bf16.mxu1 %v2557_v34 }
  0x85   :  { %2021 = vmatpush1.bf16.msra.mxu0 %v2534_v37 }
  0x86   :  { %2022 = vmatprep.subr.bf16.mxu0 %v2542_v11 }
  0x87   :  { %1947 = vmatpush1.bf16.msra.mxu1 %v2555_v55 }
  0x88   :  { %1948 = vmatprep.subr.bf16.mxu1 %v2563_v39 }
  0x89   :  { %2023 = vmatpush1.bf16.msra.mxu0 %v2540_v25 }
  0x8a   :  { %2024 = vmatprep.subr.bf16.mxu0 %v2548_v29 }
  0x8b   :  { %1949 = vmatpush1.bf16.msra.mxu1 %v2561_v45 }
  0x8c   :  { %1950 = vmatprep.subr.bf16.mxu1 %v2569_v46 }
  0x8d   :  { %2025 = vmatpush1.bf16.msra.mxu0 %v2546_v41 }
  0x8e   :  { %2026 = vmatprep.subr.bf16.mxu0 %v2554_v48 }
  0x8f   :  { %1951 = vmatpush1.bf16.msra.mxu1 %v2567_v35 }
  0x90   :  { %1952 = vmatprep.subr.bf16.mxu1 %v2575_v50 }
  0x93   :  { %1953 = vmatpush1.bf16.msra.mxu1 %v2573_v54 }
  0x94   :  { %1954 = vmatprep.subr.bf16.mxu1 %v2581_v59 }
  0x95   :  { %8 = vsyncpa [#allocation4], 0  ;;  %2027 = vmatpush1.bf16.msra.mxu0 %v2552_v63  ;;  %v2558_v1 = vld [vmem:[%s3657_s1 + $0x3b0] ss:$8 sps:$4 sm:$0xff]   ;;  %v903_v7 = vpack.c.bf16 %v3219_v38, %v3219_v38  ;;  %v154_v5 = vrot.slane %v147_v0, %v2889_v15  ;;  %v2566_v6 = vld [vmem:[%s3657_s1 + $0x3c4] ss:$8 sps:$4 sm:$0xff]   ;;  %v907_v32 = vpack.c.bf16 %v3266_v2, %v3266_v2 }
  0x96   :  { %2028 = vmatprep.subr.bf16.mxu0 %v2560_v40  ;;  %v2138_v9 = vld [vmem:[%s3656_s0 + $0x43] ss:$8 sm:$0x3]  ;;  %v114_v12 = vld [vmem:[#allocation2 + $0x10] sm:$0xf]  ;;  %vm2099_vm0 = vcmask 1041408  }
  0x97   :  { %1955 = vmatpush1.bf16.msra.mxu1 %v2579_v47  ;;  %v2141_v13 = vld [vmem:[%s3656_s0 + $0xe3] ss:$8 sm:$0x3]  ;;  %v160_v52 = vadd.f32 %v154_v5, %v114_v12  ;;  %v2572_v61 = vld [vmem:[%s3657_s1 + $0x3d4] ss:$8 sps:$4 sm:$0xff]   ;;  %vm2100_vm1 = vcmask 551938  }
  0x98   :  { %v2564_v38 = vld [vmem:[%s3657_s1 + $0x3c0] ss:$8 sps:$4 sm:$0xff]   ;;  %v199_v17 = vcombine.low %v2138_v9, %v2141_v13  ;;  %v2570_v18 = vld [vmem:[%s3657_s1 + $0x3d0] ss:$8 sps:$4 sm:$0xff]   ;;  %v2578_v16 = vld [vmem:[%s3657_s1 + $0x3e4] ss:$8 sps:$4 sm:$0xff]  }
  0x99   :  { %2029 = vmatpush1.bf16.msra.mxu0 %v2558_v1  ;;  %163 = vst [vmem:[#allocation2 + $0x10] sm:$0xf] %v160_v52  ;;  %v2576_v8 = vld [vmem:[%s3657_s1 + $0x3e0] ss:$8 sps:$4 sm:$0xff]   ;;  %v2584_v22 = vld [vmem:[%s3657_s1 + $0x3f4] ss:$8 sps:$4 sm:$0xff]   ;;  %vm2101_vm2 = vmor %vm2100_vm1, %vm2099_vm0 }
  0x9a   :  { %1957 = vmatmul.mubr.bf16.vlgmr.msra.gmra.mrb[0].mxu1 %v903_v7  ;;  %2030 = vmatprep.subr.bf16.mxu0 %v2566_v6  ;;  %v206_v19 = vrot.slane %v199_v17, %v2889_v15  ;;  %v2144_v23 = vld [vmem:[%s3656_s0 + $0x44] ss:$8 sm:$0x3]  ;;  %v2582_v21 = vld [vmem:[%s3657_s1 + $0x3f0] ss:$8 sps:$4 sm:$0xff]   ;;  %s2659_s11 = smov [#allocation3]  }
  0x9b   :  { %v2147_v14 = vld [vmem:[%s3656_s0 + $0xe4] ss:$8 sm:$0x3]  ;;  %v2585_v28 = vld [vmem:[%s3657_s1 + $0x400] ss:$8 sps:$4 sm:$0xff]   ;;  %s2109_s12 = sshll.u32 %s2659_s11, 4  ;;  %s2110_s12 = int_to_ptr.vmem [resolvable:$true] %s2109_s12 }
  0x9c   :  { %v251_v27 = vcombine.low %v2144_v23, %v2147_v14  ;;  %v2587_v26 = vld [vmem:[%s3657_s1 + $0x404] ss:$8 sps:$4 sm:$0xff]   ;;  %v2590_v33 = vld [vmem:[%s3657_s1 + $0x414] ss:$8 sps:$4 sm:$0xff]   ;;  %v2588_v36 = vld [vmem:[%s3657_s1 + $0x410] ss:$8 sps:$4 sm:$0xff]   ;;  %p2638_p1 = scmp.lt.s32.totalorder %s2110_s12, %s2110_s12 }
  0x9d   :  { %2031 = vmatpush1.bf16.msra.mxu0 %v2564_v38  ;;  %v2150_v43 = vld [vmem:[%s3656_s0 + $0x45] ss:$8 sm:$0x3]  ;;  %v2591_v39 = vld [vmem:[%s3657_s1 + $0x420] ss:$8 sps:$4 sm:$0xff]  }
  0x9e   :  { %2032 = vmatprep.subr.bf16.mxu0 %v2572_v61  ;;  %v258_v31 = vrot.slane %v251_v27, %v2889_v15  ;;  %v2153_v2 = vld [vmem:[%s3656_s0 + $0xe5] ss:$8 sm:$0x3]  ;;  %v2596_v62 = vld [vmem:[%s3657_s1 + $0x434] ss:$8 sps:$4 sm:$0xff]  }
  0x9f   :  { %v2593_v55 = vld [vmem:[%s3657_s1 + $0x424] ss:$8 sps:$4 sm:$0xff]   ;;  %v303_v37 = vcombine.low %v2150_v43, %v2153_v2  ;;  %v2594_v42 = vld [vmem:[%s3657_s1 + $0x430] ss:$8 sps:$4 sm:$0xff]   ;;  %v2597_v30 = vld [vmem:[%s3657_s1 + $0x440] ss:$8 sps:$4 sm:$0xff]  }
  0xa0   :  { %v166_v24 = vld [vmem:[#allocation2 + $0x10] sm:$0xf]  ;;  %v2599_v44 = vld [vmem:[%s3657_s1 + $0x444] ss:$8 sps:$4 sm:$0xff]   ;;  %v2602_v29 = vld [vmem:[%s3657_s1 + $0x454] ss:$8 sps:$4 sm:$0xff]  }
  0xa1   :  { %2033 = vmatpush1.bf16.msra.mxu0 %v2570_v18  ;;  %v212_v20 = vadd.f32 %v206_v19, %v166_v24  ;;  %v310_v4 = vrot.slane %v303_v37, %v2889_v15  ;;  %v2156_v10 = vld [vmem:[%s3656_s0 + $0x46] ss:$8 sm:$0x3]  ;;  %v2600_v35 = vld [vmem:[%s3657_s1 + $0x450] ss:$8 sps:$4 sm:$0xff]  }
  0xa2   :  { %2034 = vmatprep.subr.bf16.mxu0 %v2578_v16  ;;  %v2159_v45 = vld [vmem:[%s3656_s0 + $0xe6] ss:$8 sm:$0x3]  ;;  %v2162_v41 = vld [vmem:[%s3656_s0 + $0x47] ss:$8 sm:$0x3] }
  0xa3   :  { %215 = vst [vmem:[#allocation2 + $0x10] sm:$0xf] %v212_v20  ;;  %v355_v25 = vcombine.low %v2156_v10, %v2159_v45  ;;  %v2605_v53 = vld [vmem:[%s3657_s1 + $0x464] ss:$8 sps:$4 sm:$0xff]   ;;  %v2603_v56 = vld [vmem:[%s3657_s1 + $0x460] ss:$8 sps:$4 sm:$0xff]  }
  0xa4   :  { %v2165_v54 = vld [vmem:[%s3656_s0 + $0xe7] ss:$8 sm:$0x3]  ;;  %v2608_v58 = vld [vmem:[%s3657_s1 + $0x474] ss:$8 sps:$4 sm:$0xff]  }
  0xa5   :  { %2035 = vmatpush1.bf16.msra.mxu0 %v2576_v8  ;;  %v362_v50 = vrot.slane %v355_v25, %v2889_v15  ;;  %v407_v59 = vcombine.low %v2162_v41, %v2165_v54  ;;  %v2606_v60 = vld [vmem:[%s3657_s1 + $0x470] ss:$8 sps:$4 sm:$0xff]   ;;  %v2611_v63 = vld [vmem:[%s3657_s1 + $0x484] ss:$8 sps:$4 sm:$0xff]   ;;  %v2609_v40 = vld [vmem:[%s3657_s1 + $0x480] ss:$8 sps:$4 sm:$0xff]  }
  0xa6   :  { %2036 = vmatprep.subr.bf16.mxu0 %v2584_v22  ;;  %v2614_v47 = vld [vmem:[%s3657_s1 + $0x494] ss:$8 sps:$4 sm:$0xff]   ;;  %v2168_v1 = vld [vmem:[%s3656_s0 + $0x90] ss:$8 sm:$0x3] }
  0xa7   :  { %v414_v0 = vrot.slane %v407_v59, %v2889_v15  ;;  %v2171_v5 = vld [vmem:[%s3656_s0 + $0x130] ss:$8 sm:$0x3]  ;;  %v2617_v13 = vld [vmem:[%s3657_s1 + $0x4a4] ss:$8 sps:$4 sm:$0xff]  }
  0xa8   :  { %v2612_v9 = vld [vmem:[%s3657_s1 + $0x490] ss:$8 sps:$4 sm:$0xff]   ;;  %v459_v12 = vcombine.low %v2168_v1, %v2171_v5  ;;  %v2615_v38 = vld [vmem:[%s3657_s1 + $0x4a0] ss:$8 sps:$4 sm:$0xff]   ;;  %v2620_v61 = vld [vmem:[%s3657_s1 + $0x4b4] ss:$8 sps:$4 sm:$0xff]  }
  0xa9   :  { %2037 = vmatpush1.bf16.msra.mxu0 %v2582_v21  ;;  %v2174_v17 = vld [vmem:[%s3656_s0 + $0x91] ss:$8 sm:$0x3]  ;;  %v2623_v22 = vld [vmem:[%s3657_s1 + $0x4c4] ss:$8 sps:$4 sm:$0xff]  }
  0xaa   :  { %2047 = vmatprep.subr.bf16.mxu0 %v2587_v26  ;;  %v218_v34 = vld [vmem:[#allocation2 + $0x10] sm:$0xf]  ;;  %v466_v52 = vrot.slane %v459_v12, %v2889_v15  ;;  %v2621_v24 = vld [vmem:[%s3657_s1 + $0x4c0] ss:$8 sps:$4 sm:$0xff]   ;;  %v2626_v14 = vld [vmem:[%s3657_s1 + $0x4d4] ss:$8 sps:$4 sm:$0xff]  }
  0xab   :  { %v264_v49 = vadd.f32 %v258_v31, %v218_v34  ;;  %v2177_v16 = vld [vmem:[%s3656_s0 + $0x131] ss:$8 sm:$0x3]  ;;  %v2629_v27 = vld [vmem:[%s3657_s1 + $0x4e4] ss:$8 sps:$4 sm:$0xff]  }
  0xac   :  { %2039 = vmatmul.mubr.bf16.vlgmr.msra.gmra.mrb[0].mxu0 %v907_v32  ;;  %v2618_v19 = vld [vmem:[%s3657_s1 + $0x4b0] ss:$8 sps:$4 sm:$0xff]   ;;  %v511_v23 = vcombine.low %v2174_v17, %v2177_v16  ;;  %v2632_v34 = vld [vmem:[%s3657_s1 + $0x4f4] ss:$8 sps:$4 sm:$0xff]   ;;  %v1075_v16 = vsub.s32 0, %v2824_v51 }
  0xad   :  { %2048 = vmatpush1.bf16.msra.mxu0 %v2585_v28  ;;  %267 = vst [vmem:[#allocation2 + $0x10] sm:$0xf] %v264_v49  ;;  %v2624_v21 = vld [vmem:[%s3657_s1 + $0x4d0] ss:$8 sps:$4 sm:$0xff]  }
  0xae   :  { %2049 = vmatprep.subr.bf16.mxu0 %v2590_v33  ;;  %v518_v20 = vrot.slane %v511_v23, %v2889_v15  ;;  %v2180_v26 = vld [vmem:[%s3656_s0 + $0x92] ss:$8 sm:$0x3]  ;;  %v2627_v33 = vld [vmem:[%s3657_s1 + $0x4e0] ss:$8 sps:$4 sm:$0xff]  }
  0xaf   :  { %v2183_v28 = vld [vmem:[%s3656_s0 + $0x132] ss:$8 sm:$0x3]  ;;  %v2186_v49 = vld [vmem:[%s3656_s0 + $0x93] ss:$8 sm:$0x3] }
  0xb0   :  { %v563_v43 = vcombine.low %v2180_v26, %v2183_v28  ;;  %v2630_v2 = vld [vmem:[%s3657_s1 + $0x4f0] ss:$8 sps:$4 sm:$0xff]   ;;  %v2195_v10 = vld [vmem:[%s3656_s0 + $0x134] ss:$8 sm:$0x3] }
  0xb1   :  { %2050 = vmatpush1.bf16.msra.mxu0 %v2588_v36  ;;  %v2189_v37 = vld [vmem:[%s3656_s0 + $0x133] ss:$8 sm:$0x3]  ;;  %v2204_v41 = vld [vmem:[%s3656_s0 + $0x96] ss:$8 sm:$0x3] }
  0xb2   :  { %2051 = vmatprep.subr.bf16.mxu0 %v2593_v55  ;;  %v570_v36 = vrot.slane %v563_v43, %v2889_v15  ;;  %v2207_v54 = vld [vmem:[%s3656_s0 + $0x136] ss:$8 sm:$0x3]  ;;  %v2210_v59 = vld [vmem:[%s3656_s0 + $0x97] ss:$8 sm:$0x3] }
  0xb4   :  { %v270_v11 = vld [vmem:[#allocation2 + $0x10] sm:$0xf] }
  0xb5   :  { %2052 = vmatpush1.bf16.msra.mxu0 %v2591_v39  ;;  %v316_v46 = vadd.f32 %v310_v4, %v270_v11 }
  0xb6   :  { %2053 = vmatprep.subr.bf16.mxu0 %v2596_v62  ;;  %v615_v62 = vcombine.low %v2186_v49, %v2189_v37 }
  0xb7   :  { %319 = vst [vmem:[#allocation2 + $0x10] sm:$0xf] %v316_v46 }
  0xb8   :  { %v622_v4 = vrot.slane %v615_v62, %v2889_v15 }
  0xb9   :  { %2054 = vmatpush1.bf16.msra.mxu0 %v2594_v42  ;;  %v2192_v42 = vld [vmem:[%s3656_s0 + $0x94] ss:$8 sm:$0x3] }
  0xba   :  { %2055 = vmatprep.subr.bf16.mxu0 %v2599_v44  ;;  %v667_v45 = vcombine.low %v2192_v42, %v2195_v10 }
  0xbc   :  { %v674_v46 = vrot.slane %v667_v45, %v2889_v15 }
  0xbd   :  { %2056 = vmatpush1.bf16.msra.mxu0 %v2597_v30  ;;  %v2198_v30 = vld [vmem:[%s3656_s0 + $0x95] ss:$8 sm:$0x3] }
  0xbe   :  { %2057 = vmatprep.subr.bf16.mxu0 %v2602_v29  ;;  %v322_v48 = vld [vmem:[#allocation2 + $0x10] sm:$0xf]  ;;  %v2201_v29 = vld [vmem:[%s3656_s0 + $0x135] ss:$8 sm:$0x3] }
  0xbf   :  { %v368_v57 = vadd.f32 %v362_v50, %v322_v48  ;;  %v719_v50 = vcombine.low %v2198_v30, %v2201_v29 }
  0xc1   :  { %2058 = vmatpush1.bf16.msra.mxu0 %v2600_v35  ;;  %371 = vst [vmem:[#allocation2 + $0x10] sm:$0xf] %v368_v57  ;;  %v771_v57 = vcombine.low %v2204_v41, %v2207_v54 }
  0xc2   :  { %2059 = vmatprep.subr.bf16.mxu0 %v2605_v53  ;;  %v726_v53 = vrot.slane %v719_v50, %v2889_v15 }
  0xc5   :  { %2060 = vmatpush1.bf16.msra.mxu0 %v2603_v56 }
  0xc6   :  { %2061 = vmatprep.subr.bf16.mxu0 %v2608_v58  ;;  %v778_v58 = vrot.slane %v771_v57, %v2889_v15 }
  0xc8   :  { %v374_v7 = vld [vmem:[#allocation2 + $0x10] sm:$0xf] }
  0xc9   :  { %2062 = vmatpush1.bf16.msra.mxu0 %v2606_v60  ;;  %v420_v6 = vadd.f32 %v414_v0, %v374_v7 }
  0xca   :  { %2063 = vmatprep.subr.bf16.mxu0 %v2611_v63  ;;  %v2213_v63 = vld [vmem:[%s3656_s0 + $0x137] ss:$8 sm:$0x3] }
  0xcb   :  { %423 = vst [vmem:[#allocation2 + $0x10] sm:$0xf] %v420_v6 }
  0xcd   :  { %2064 = vmatpush1.bf16.msra.mxu0 %v2609_v40  ;;  %v823_v40 = vcombine.low %v2210_v59, %v2213_v63 }
  0xce   :  { %2065 = vmatprep.subr.bf16.mxu0 %v2614_v47 }
  0xcf   :  { %v830_v47 = vrot.slane %v823_v40, %v2889_v15  ;;  %v1071_v15 = vld [vmem:[%s3658_s2] sm:$0x3]  ;;  %s2633_s2 = scalar_lea.vmem %s2110_s12, 64 }
  0xd0   :  { %p2634_p0 = scmp.ne.s32.totalorder %s2110_s12, %s2633_s2  ;;  %p2639_p2 = scmp.lt.s32.totalorder %s2633_s2, %s2633_s2 }
  0xd1   :  { %2066 = vmatpush1.bf16.msra.mxu0 %v2612_v9 }
  0xd2   :  { %2067 = vmatprep.subr.bf16.mxu0 %v2617_v13  ;;  %v426_v18 = vld [vmem:[#allocation2 + $0x10] sm:$0xf]  ;;  %p2640_p3 = por %p2639_p2, %p2638_p1 }
  0xd3   :  { %v472_v8 = vadd.f32 %v466_v52, %v426_v18 }
  0xd4   :  { %p2641_p4 = pnand %p2640_p3, %p2634_p0 }
  0xd5   :  { %2068 = vmatpush1.bf16.msra.mxu0 %v2615_v38  ;;  %475 = vst [vmem:[#allocation2 + $0x10] sm:$0xf] %v472_v8  ;;  %v1076_v8 = vrot.slane %v1071_v15, %v1075_v16 }
  0xd6   :  { %2069 = vmatprep.subr.bf16.mxu0 %v2620_v61 }
  0xd9   :  { %2070 = vmatpush1.bf16.msra.mxu0 %v2618_v19  ;;  %v1079_v19 = vsub.s32 1, %v2824_v51 }
  0xda   :  { %2071 = vmatprep.subr.bf16.mxu0 %v2623_v22 }
  0xdb   :  { %v1080_v22 = vrot.slane %v1071_v15, %v1079_v19 }
  0xdc   :  { %v478_v32 = vld [vmem:[#allocation2 + $0x10] sm:$0xf] }
  0xdd   :  { %2072 = vmatpush1.bf16.msra.mxu0 %v2621_v24  ;;  %v524_v31 = vadd.f32 %v518_v20, %v478_v32 }
  0xde   :  { %2073 = vmatprep.subr.bf16.mxu0 %v2626_v14 }
  0xdf   :  { %527 = vst [vmem:[#allocation2 + $0x10] sm:$0xf] %v524_v31 }
  0xe1   :  { %2074 = vmatpush1.bf16.msra.mxu0 %v2624_v21 }
  0xe2   :  { %2075 = vmatprep.subr.bf16.mxu0 %v2629_v27 }
  0xe5   :  { %2076 = vmatpush1.bf16.msra.mxu0 %v2627_v33 }
  0xe6   :  { %2077 = vmatprep.subr.bf16.mxu0 %v2632_v34  ;;  %v530_v55 = vld [vmem:[#allocation2 + $0x10] sm:$0xf] }
  0xe7   :  { %v576_v39 = vadd.f32 %v570_v36, %v530_v55 }
  0xe9   :  { %2078 = vmatpush1.bf16.msra.mxu0 %v2630_v2  ;;  %579 = vst [vmem:[#allocation2 + $0x10] sm:$0xf] %v576_v39 }
  0xf0   :  { %v582_v44 = vld [vmem:[#allocation2 + $0x10] sm:$0xf] }
  0xf1   :  { %v628_v11 = vadd.f32 %v622_v4, %v582_v44 }
  0xf3   :  { %631 = vst [vmem:[#allocation2 + $0x10] sm:$0xf] %v628_v11 }
  0xfa   :  { %v634_v25 = vld [vmem:[#allocation2 + $0x10] sm:$0xf] }
  0xfb   :  { %v680_v35 = vadd.f32 %v674_v46, %v634_v25 }
  0xfd   :  { %683 = vst [vmem:[#allocation2 + $0x10] sm:$0xf] %v680_v35 }
 0x104   :  { %v686_v48 = vld [vmem:[#allocation2 + $0x10] sm:$0xf] }
 0x105   :  { %v732_v56 = vadd.f32 %v726_v53, %v686_v48 }
 0x107   :  { %735 = vst [vmem:[#allocation2 + $0x10] sm:$0xf] %v732_v56 }
 0x10e   :  { %v738_v60 = vld [vmem:[#allocation2 + $0x10] sm:$0xf] }
 0x10f   :  { %v784_v0 = vadd.f32 %v778_v58, %v738_v60 }
 0x111   :  { %787 = vst [vmem:[#allocation2 + $0x10] sm:$0xf] %v784_v0 }
 0x118   :  { %v790_v1 = vld [vmem:[#allocation2 + $0x10] sm:$0xf] }
 0x119   :  { %v836_v7 = vadd.f32 %v830_v47, %v790_v1 }
 0x11b   :  { %839 = vst [vmem:[#allocation2 + $0x10] sm:$0xf] %v836_v7 }
 0x122   :  { %v842_v5 = vld [vmem:[#allocation2 + $0x10] sm:$0xf] }
 0x123   :  { %v845_v6 = vmul.f32 0.0625, %v842_v5 }
 0x125   :  { %v889_v9 = vrot.slane %v845_v6, %v3206_v3 }
 0x127   :  { %v890_v12 = vcombine.high %v889_v9, %v889_v9  ;;  %v909_v13 = vpack.c.bf16 %v889_v9, %v889_v9 }
 0x129   :  { %v910_v38 = vpack.c.bf16 %v890_v12, %v890_v12 }
 0x12b   :  { %2079 = vmatprep.mubr.bf16.mxu0 %v910_v38 }
 0x12c   :  { %2080 = vmatmul.mubr.bf16.vlgmr.msra.gmra.mrb[0].mxu0 %v909_v13 }
 0x16d   :  { %v1958_v52 = vpop.f32.mrb[0].mxu1 }
 0x16e   :  { %v1960_v61 = vpop.f32.mrb[1].mxu1  ;;  %v2374_v23 = vadd.f32 %v1958_v52, %v1076_v8 }
 0x16f   :  { %v1962_v17 = vpop.f32.mrb[2].mxu1  ;;  %v2376_v24 = vadd.f32 %v1960_v61, %v1080_v22 }
 0x170   :  { %v1963_v18 = vpop.f32.mrb[3].mxu1 }
 0x1ff   :  { %v2081_v14 = vpop.f32.mrb[0].mxu0 }
 0x200   :  { %v2375_v20 = vadd.f32 %v2374_v23, %v2081_v14  ;;  %v2083_v21 = vpop.f32.mrb[1].mxu0 }
 0x201   :  { %v2377_v27 = vadd.f32 %v2376_v24, %v2083_v21  ;;  %v2085_v26 = vpop.f32.mrb[2].mxu0 }
 0x202   :  { %v2086_v32 = vpop.f32.mrb[3].mxu0 }
 0x203   :  { %v2090_v28 = vcombine.low %v2375_v20, %v2377_v27 }
 0x205   :  { %v2097_v31 = vrot.slane %v2090_v28, %v3206_v3 }
 0x207   :  { %2102 = vst.msk [vmem:[#allocation3] sm:$0xf] %vm2101_vm2, %v2097_v31 }
 0x208   :  { %2644 = shalt.err (!%p2641_p4)
}
 0x209   :  { %s2645_s15 = scalar_lea.hbm %s3659_s3, 64 }
 0x20a   :  { %p2646_p5 = scmp.ne.s32.totalorder %s3659_s3, %s2645_s15  ;;  %p2649_p6 = scmp.lt.u32.totalorder %s2645_s15, %s3659_s3 }
 0x20c   :  { %p2651_p7 = pnand %p2649_p6, %p2646_p5 }
 0x20e   :  { %2654 = shalt.err (!%p2651_p7)
}
 0x20f   :  { %2112 = dma.vmem_to_hbm [thread:$0]  %s2110_s12, 64, %s3659_s3, [#allocation4]  }
 0x210   :  { %2655 = dma.done.wait [#allocation4], 64  }
 0x211   :  { %2656 = vsyncadd [#allocation4], 4294967232 }
 0x212   :  { %2116 = vsyncpa [#allocation4], 1 }

</bundles_post_ra>
